<compile_context>
chip_gen: v7x
topology: tpu7x:2x2x1
jax: 0.10.0
libtpu: 0.0.40
codegen_flags: <defaults>
</compile_context>

<pallas_src>
import functools

import jax
import jax.numpy as jnp
from jax.experimental import pallas as pl
from jax.experimental.pallas import tpu as pltpu

_POSE_DIM = 6      # DECA pose-code size; first 3 = global pose axis-angle
_SO3_EPS = 1e-3    # eps passed to so3_relative_angle(..., eps=0.001) in the ref

# Abramowitz & Stegun 4.4.46 arccos polynomial (|err| <= 2e-8 on [0, 1]).
_ACOS_COEFFS = (1.5707963050, -0.2145988016, 0.0889789874, -0.0501743046,
                0.0308918810, -0.0170881256, 0.0066700901, -0.0012624911)


def _cdiv(a, b):
    return -(-a // b)


def _round_up(x, m):
    return _cdiv(x, m) * m


def _acos(x):
    """Elementwise arccos built from sqrt/mul/add/where (Mosaic-safe)."""
    ax = jnp.abs(x)
    p = jnp.full_like(ax, _ACOS_COEFFS[-1])
    for coef in _ACOS_COEFFS[-2::-1]:
        p = p * ax + coef
    r = jnp.sqrt(jnp.maximum(1.0 - ax, 0.0)) * p
    return jnp.where(x >= 0.0, r, jnp.pi - r)


def _euler_row(i, ca, sa, cb, sb, cg, sg):
    """Row i of Rx(a) @ Ry(b) @ Rz(g) (pytorch3d euler_angles_to_matrix 'XYZ')."""
    if i == 0:
        return (cb * cg, -cb * sg, sb)
    if i == 1:
        return (sa * sb * cg + ca * sg, -sa * sb * sg + ca * cg, -sa * cb)
    return (-ca * sb * cg + sa * sg, ca * sb * sg + sa * cg, ca * cb)


def _rodrigues_row(i, ct, st, omc, ux, uy, uz):
    """Row i of the axis-angle rotation matrix (Rodrigues)."""
    if i == 0:
        return (omc * ux * ux + ct, omc * ux * uy - st * uz, omc * ux * uz + st * uy)
    if i == 1:
        return (omc * ux * uy + st * uz, omc * uy * uy + ct, omc * uy * uz - st * ux)
    return (omc * ux * uz - st * uy, omc * uy * uz + st * ux, omc * uz * uz + ct)


def _pose_energy_kernel(can_ref, w_ref, b_ref, img_ref, euler_ref,
                        loss_ref, acc_ref, *, inv_hw, channels, acc_lanes,
                        lane_chunks):
    """Grid = (batch blocks [parallel], spatial tiles [arbitrary])."""
    k = pl.program_id(1)
    bt = loss_ref.shape[0]

    # ---------------- streamed global-average-pool (partial sums) -----------
    @pl.when(k == 0)
    def _init():
        acc_ref[...] = jnp.zeros_like(acc_ref)

    # Lane-wide f32 accumulator: only full-vreg VALU adds per streamed chunk.
    # No per-step cross-lane (XLU) reduce and no per-step masked 1-lane store;
    # the single lane reduce happens once per batch block in _finalize.
    # (For sub-32-bit inputs on v7x an MXU ones-matmul reduction would keep the
    #  kernel on the HBM roofline; the VPU path is fine for f32/bf16 here.)
    acc = acc_ref[...]
    for j in range(lane_chunks):                         # bounded static unroll
        chunk = img_ref[:, j * acc_lanes:(j + 1) * acc_lanes]   # (bt*C, acc_lanes)
        acc = acc + chunk.astype(jnp.float32)
    acc_ref[...] = acc

    # ---------------- finalize once per batch block --------------------------
    @pl.when(k == pl.num_programs(1) - 1)
    def _finalize():
        # TODO(synk): real module runs a pretrained DECA (ResNet50) encoder and
        # a bicubic Resize(224); replaced by GAP-over-spatial + linear head.
        zeros = jnp.zeros((bt, 1), jnp.float32)
        wx = zeros + b_ref[0]
        wy = zeros + b_ref[1]
        wz = zeros + b_ref[2]
        # Tiny pose head over the raw channels (C = 3-4): unrolled VPU FMAs
        # with SMEM scalar weights.  NOTE: if the feature dim ever becomes a
        # real encoder width (e.g. 2048), replace this loop with an MXU matmul.
        for c in range(channels):
            # channel-c rows for every batch element: sublane-strided read of
            # the folded (b*C + c) accumulator.
            rows_c = acc_ref[pl.ds(c, bt, stride=channels), :]  # (bt, acc_lanes)
            fc = jnp.sum(rows_c, axis=-1, keepdims=True) * inv_hw
            wx = wx + fc * w_ref[c, 0]
            wy = wy + fc * w_ref[c, 1]
            wz = wz + fc * w_ref[c, 2]

        # --------- axis_angle_to_matrix(code[:, :3]) (Rodrigues params) -----
        theta = jnp.sqrt(wx * wx + wy * wy + wz * wz)
        ct = jnp.cos(theta)
        st = jnp.sin(theta)
        omc = 1.0 - ct
        inv = jnp.where(theta < 1e-8, 0.0, 1.0 / jnp.maximum(theta, 1e-20))
        ux = wx * inv
        uy = wy * inv
        uz = wz * inv

        # --------- euler_angles_to_matrix(rel_pose_euler, 'XYZ') params -----
        ea = euler_ref[:, 0:1]
        eb = euler_ref[:, 1:2]
        eg = euler_ref[:, 2:3]
        ca, sa = jnp.cos(ea), jnp.sin(ea)
        cb, sb = jnp.cos(eb), jnp.sin(eb)
        cg, sg = jnp.cos(eg), jnp.sin(eg)

        # trace(T @ G^T) with T = E @ K (K = canonical pose, scalars in SMEM),
        # accumulated row-by-row to keep live vregs low.
        tr = jnp.zeros_like(wx)
        for i in range(3):
            e_i = _euler_row(i, ca, sa, cb, sb, cg, sg)
            g_i = _rodrigues_row(i, ct, st, omc, ux, uy, uz)
            for j in range(3):
                t_ij = (e_i[0] * can_ref[0, j] +
                        e_i[1] * can_ref[1, j] +
                        e_i[2] * can_ref[2, j])
                tr = tr + t_ij * g_i[j]

        # so3_relative_angle(target, global)**2: cos = (tr-1)/2, clamp, acos, sq
        cos_phi = jnp.clip(0.5 * (tr - 1.0), -1.0 + _SO3_EPS, 1.0 - _SO3_EPS)
        # TODO(synk): pytorch3d uses acos_linear_extrapolation outside the
        # bound and wraps the call in try/except (trace-range ValueError -> 0);
        # a hard clamp with no exception path is used here.
        phi = _acos(cos_phi)
        loss_ref[...] = phi * phi                             # (bt, 1)


def _euler_xyz_to_matrix(angles):
    """Plain-JAX glue replicating the canonical_pose buffer built in __init__."""
    a, b, g = angles[0], angles[1], angles[2]
    ca, sa = jnp.cos(a), jnp.sin(a)
    cb, sb = jnp.cos(b), jnp.sin(b)
    cg, sg = jnp.cos(g), jnp.sin(g)
    return jnp.array(
        [[cb * cg, -cb * sg, sb],
         [sa * sb * cg + ca * sg, -sa * sb * sg + ca * cg, -sa * cb],
         [-ca * sb * cg + sa * sg, ca * sb * sg + sa * cg, ca * cb]],
        dtype=jnp.float32)


def _vmem_capacity_bytes():
    """Generation-aware VMEM capacity (v5e/v6e: 128 MiB, v7x: 64 MiB/TC)."""
    get_info = getattr(pltpu, "get_tpu_info", None)
    if get_info is not None:
        try:
            cap = getattr(get_info(), "vmem_capacity_bytes", None)
            if cap:
                return int(cap)
        except Exception:
            pass
    return 64 << 20        # conservative fallback (v7x per-TensorCore VMEM)


def pose_energy_forward(img_nchw, rel_pose_euler, canonical_pose_euler,
                        enc_w, enc_b, *, batch_block=None, max_hw_tile=32768):
    """PoseEnergy.forward: returns pose_loss of shape (B,)."""
    B, C, H, W = img_nchw.shape
    HW = H * W
    itemsize = jnp.dtype(img_nchw.dtype).itemsize

    # ---- batch blocking: n_b >= 2 feeds v7x's 2nd TensorCore when it costs
    #      no sublane padding; otherwise keep one big block (v5e/v6e, 1 TC). --
    if batch_block and B % batch_block == 0:
        bt = batch_block
    elif B % 2 == 0 and ((B // 2) * C) % 8 == 0:
        bt = B // 2
    else:
        bt = B
    n_b = B // bt
    rows = bt * C                     # batch & channel folded onto sublanes

    # ---- spatial tile sized from a VMEM byte budget --------------------------
    vmem_cap = _vmem_capacity_bytes()
    sub = 8 * max(1, 4 // itemsize)                     # sublane packing of dtype
    padded_rows = _round_up(rows, sub)
    block_budget = min(16 << 20, vmem_cap // 6)         # one (of two) input blocks
    max_lanes = max(128, (block_budget // (padded_rows * itemsize)) // 128 * 128)
    max_lanes = min(max_lanes, max(128, max_hw_tile // 128 * 128))
    hw_tile = min(max_lanes, _round_up(HW, 128))
    n_hw = _cdiv(HW, hw_tile)
    hw_tile = _round_up(_cdiv(HW, n_hw), 128)           # minimize tail padding
    hw_pad = n_hw * hw_tile

    # ---- accumulator lane width: widest that keeps acc resident in vregs -----
    acc_bound = max(128, min(512, (16 // _cdiv(rows, 8)) * 128))
    acc_lanes = 128
    for cand in (512, 384, 256, 128):
        if cand <= acc_bound and hw_tile % cand == 0:
            acc_lanes = cand
            break
    lane_chunks = hw_tile // acc_lanes

    # ---- VMEM accounting (double-buffered image block + scratch) -------------
    img_block_bytes = padded_rows * hw_tile * itemsize
    acc_bytes = _round_up(rows, 8) * acc_lanes * 4
    vmem_need = 2 * img_block_bytes + acc_bytes + (1 << 20)
    assert vmem_need <= vmem_cap, (
        f"blocks need {vmem_need} B of VMEM but chip has {vmem_cap} B; "
        f"lower max_hw_tile or batch_block")
    vmem_limit = int(min(vmem_cap, max(vmem_need + (4 << 20), 32 << 20)))

    canonical = _euler_xyz_to_matrix(
        jnp.asarray(canonical_pose_euler, jnp.float32))          # (3, 3) SMEM
    w = jnp.asarray(enc_w, jnp.float32)                          # (C, 6)  SMEM
    b = jnp.asarray(enc_b, jnp.float32).reshape(-1)              # (6,)    SMEM

    # Native dtype (no wrapper cast); sublane index = b*C + c is a free view of
    # contiguous NCHW.  Zero-padding HW is exact for sum-then-divide GAP.
    img3 = img_nchw.reshape(B, C, HW)
    if hw_pad != HW:
        img3 = jnp.pad(img3, ((0, 0), (0, 0), (0, hw_pad - HW)))
    img = img3.reshape(n_b, rows, hw_pad)
    euler = jnp.asarray(rel_pose_euler, jnp.float32).reshape(n_b, bt, 3)

    kernel = functools.partial(
        _pose_energy_kernel, inv_hw=1.0 / float(HW), channels=C,
        acc_lanes=acc_lanes, lane_chunks=lane_chunks)

    cost = pl.CostEstimate(
        flops=int(B * C * HW + 700 * B),
        transcendentals=int(16 * B),
        bytes_accessed=int(B * C * hw_pad * itemsize + B * 16 + 256))

    loss = pl.pallas_call(
        kernel,
        out_shape=jax.ShapeDtypeStruct((n_b, bt, 1), jnp.float32),
        grid=(n_b, n_hw),
        in_specs=[
            pl.BlockSpec(memory_space=pltpu.MemorySpace.SMEM),   # canonical 3x3
            pl.BlockSpec(memory_space=pltpu.MemorySpace.SMEM),   # head weight
            pl.BlockSpec(memory_space=pltpu.MemorySpace.SMEM),   # head bias
            pl.BlockSpec((None, rows, hw_tile),                  # streamed image
                         lambda i, k: (i, 0, k)),
            pl.BlockSpec((None, bt, 3),                          # rel pose euler
                         lambda i, k: (i, 0, 0)),
        ],
        out_specs=pl.BlockSpec((None, bt, 1), lambda i, k: (i, 0, 0)),
        scratch_shapes=[pltpu.VMEM((rows, acc_lanes), jnp.float32)],
        compiler_params=pltpu.CompilerParams(
            dimension_semantics=("parallel", "arbitrary"),
            vmem_limit_bytes=vmem_limit),
        cost_estimate=cost,
    )(canonical, w, b, img, euler)
    return loss.reshape(B)                                       # (B,)


if __name__ == "__main__":
    key = jax.random.PRNGKey(0)
    k_img, k_euler, k_w, k_b = jax.random.split(key, 4)

    B, C, H, W = 4, 3, 16, 16
    img = jax.random.uniform(k_img, (B, C, H, W), jnp.float32)             # NCHW
    rel_pose_euler = jax.random.uniform(k_euler, (B, 3), jnp.float32,
                                        minval=-0.5, maxval=0.5)
    canonical_pose_euler = jnp.array([0.1, -0.2, 0.05], jnp.float32)

    # deterministic synthetic "DECA pose head" parameters
    enc_w = 0.1 * jax.random.normal(k_w, (C, _POSE_DIM), jnp.float32)
    enc_b = 0.1 * jax.random.normal(k_b, (1, _POSE_DIM), jnp.float32)

    # Small shapes: batch_block=2 exercises the parallel batch axis (n_b=2) and
    # the folded-channel finalize; max_hw_tile=128 forces multi-step streaming.
    pose_loss = pose_energy_forward(img, rel_pose_euler, canonical_pose_euler,
                                    enc_w, enc_b,
                                    batch_block=2, max_hw_tile=128)
    jax.block_until_ready(pose_loss)
    assert pose_loss.shape == (B,)
    print("KERNEL_OK")
</pallas_src>

<mosaic_0001>
module attributes {stable_mosaic.version = 11 : i64} {
  func.func @_pose_energy_kernel(%arg0: i32, %arg1: i32, %arg2: memref<3x3xf32, #tpu.memory_space<smem>>, %arg3: memref<3x6xf32, #tpu.memory_space<smem>>, %arg4: memref<6xf32, #tpu.memory_space<smem>>, %arg5: memref<1x6x128xf32, #tpu.memory_space<vmem>>, %arg6: memref<1x2x3xf32, #tpu.memory_space<vmem>>, %arg7: memref<1x2x1xf32, #tpu.memory_space<vmem>>, %arg8: memref<6x128xf32, #tpu.memory_space<vmem>>) attributes {dimension_semantics = [#tpu.dimension_semantics<parallel>, #tpu.dimension_semantics<arbitrary>], iteration_bounds = array<i64: 2, 2>, scalar_prefetch = 0 : i64, scratch_operands = 1 : i64, tpu.core_type = #tpu.core_type<tc>, window_params = [{transform_indices = @transform_0, window_bounds = array<i64: 3, 3>}, {transform_indices = @transform_1, window_bounds = array<i64: 3, 6>}, {transform_indices = @transform_2, window_bounds = array<i64: 6>}, {transform_indices = @transform_3, window_bounds = array<i64: 1, 6, 128>}, {transform_indices = @transform_4, window_bounds = array<i64: 1, 2, 3>}, {transform_indices = @transform_5, window_bounds = array<i64: 1, 2, 1>}]} {
    %c0_i32 = arith.constant 0 : i32
    %0 = arith.cmpi eq, %arg1, %c0_i32 : i32
    %1 = arith.extui %0 : i1 to i32
    %c0_i32_0 = arith.constant 0 : i32
    %2 = arith.cmpi ne, %1, %c0_i32_0 : i32
    scf.if %2 {
      %cst = arith.constant 0.000000e+00 : f32
      %11 = vector.broadcast %cst : f32 to vector<6x128xf32>
      %c0_8 = arith.constant 0 : index
      %c0_9 = arith.constant 0 : index
      %12 = vector.load %arg8[%c0_8, %c0_9] : memref<6x128xf32, #tpu.memory_space<vmem>>, vector<6x128xf32>
      tpu.vector_store %arg8[%c0_8, %c0_9], %11 {strides = array<i32>} : memref<6x128xf32, #tpu.memory_space<vmem>>, vector<6x128xf32>,
    } else {
    }
    %c0 = arith.constant 0 : index
    %c0_1 = arith.constant 0 : index
    %3 = vector.load %arg8[%c0, %c0_1] : memref<6x128xf32, #tpu.memory_space<vmem>>, vector<6x128xf32>
    %c0_2 = arith.constant 0 : index
    %c0_3 = arith.constant 0 : index
    %c0_4 = arith.constant 0 : index
    %4 = vector.load %arg5[%c0_2, %c0_3, %c0_4] : memref<1x6x128xf32, #tpu.memory_space<vmem>>, vector<1x6x128xf32>
    %5 = vector.shape_cast %4 : vector<1x6x128xf32> to vector<6x128xf32>
    %6 = arith.addf %3, %5 : vector<6x128xf32>
    %c0_5 = arith.constant 0 : index
    %c0_6 = arith.constant 0 : index
    %7 = vector.load %arg8[%c0_5, %c0_6] : memref<6x128xf32, #tpu.memory_space<vmem>>, vector<6x128xf32>
    tpu.vector_store %arg8[%c0_5, %c0_6], %6 {strides = array<i32>} : memref<6x128xf32, #tpu.memory_space<vmem>>, vector<6x128xf32>,
    %c1_i32 = arith.constant 1 : i32
    %8 = arith.cmpi eq, %arg1, %c1_i32 : i32
    %9 = arith.extui %8 : i1 to i32
    %c0_i32_7 = arith.constant 0 : i32
    %10 = arith.cmpi ne, %9, %c0_i32_7 : i32
    scf.if %10 {
      %cst = arith.constant 0.000000e+00 : f32
      %11 = vector.broadcast %cst : f32 to vector<2x1xf32>
      %c0_8 = arith.constant 0 : index
      %12 = memref.load %arg4[%c0_8] : memref<6xf32, #tpu.memory_space<smem>>
      %13 = vector.broadcast %12 : f32 to vector<2x1xf32>
      %14 = arith.addf %11, %13 : vector<2x1xf32>
      %c1 = arith.constant 1 : index
      %15 = memref.load %arg4[%c1] : memref<6xf32, #tpu.memory_space<smem>>
      %16 = vector.broadcast %15 : f32 to vector<2x1xf32>
      %17 = arith.addf %11, %16 : vector<2x1xf32>
      %c2 = arith.constant 2 : index
      %18 = memref.load %arg4[%c2] : memref<6xf32, #tpu.memory_space<smem>>
      %19 = vector.broadcast %18 : f32 to vector<2x1xf32>
      %20 = arith.addf %11, %19 : vector<2x1xf32>
      %c0_9 = arith.constant 0 : index
      %c0_10 = arith.constant 0 : index
      %21 = tpu.strided_load %arg8[%c0_9, %c0_10] {strides = array<i32: 3, 1>} : memref<6x128xf32, #tpu.memory_space<vmem>>, vector<2x128xf32>
      %cst_11 = arith.constant dense<0.000000e+00> : vector<2xf32>
      %22 = vector.multi_reduction <add>, %21, %cst_11 [1] : vector<2x128xf32> to vector<2xf32>
      %23 = vector.shape_cast %22 : vector<2xf32> to vector<2x1xf32>
      %cst_12 = arith.constant 3.906250e-03 : f32
      %24 = vector.broadcast %cst_12 : f32 to vector<2x1xf32>
      %25 = arith.mulf %23, %24 : vector<2x1xf32>
      %c0_13 = arith.constant 0 : index
      %c0_14 = arith.constant 0 : index
      %26 = memref.load %arg3[%c0_13, %c0_14] : memref<3x6xf32, #tpu.memory_space<smem>>
      %27 = vector.broadcast %26 : f32 to vector<2x1xf32>
      %28 = arith.mulf %25, %27 : vector<2x1xf32>
      %29 = arith.addf %14, %28 : vector<2x1xf32>
      %c0_15 = arith.constant 0 : index
      %c1_16 = arith.constant 1 : index
      %30 = memref.load %arg3[%c0_15, %c1_16] : memref<3x6xf32, #tpu.memory_space<smem>>
      %31 = vector.broadcast %30 : f32 to vector<2x1xf32>
      %32 = arith.mulf %25, %31 : vector<2x1xf32>
      %33 = arith.addf %17, %32 : vector<2x1xf32>
      %c0_17 = arith.constant 0 : index
      %c2_18 = arith.constant 2 : index
      %34 = memref.load %arg3[%c0_17, %c2_18] : memref<3x6xf32, #tpu.memory_space<smem>>
      %35 = vector.broadcast %34 : f32 to vector<2x1xf32>
      %36 = arith.mulf %25, %35 : vector<2x1xf32>
      %37 = arith.addf %20, %36 : vector<2x1xf32>
      %c1_19 = arith.constant 1 : index
      %c0_20 = arith.constant 0 : index
      %38 = tpu.strided_load %arg8[%c1_19, %c0_20] {strides = array<i32: 3, 1>} : memref<6x128xf32, #tpu.memory_space<vmem>>, vector<2x128xf32>
      %cst_21 = arith.constant dense<0.000000e+00> : vector<2xf32>
      %39 = vector.multi_reduction <add>, %38, %cst_21 [1] : vector<2x128xf32> to vector<2xf32>
      %40 = vector.shape_cast %39 : vector<2xf32> to vector<2x1xf32>
      %cst_22 = arith.constant 3.906250e-03 : f32
      %41 = vector.broadcast %cst_22 : f32 to vector<2x1xf32>
      %42 = arith.mulf %40, %41 : vector<2x1xf32>
      %c1_23 = arith.constant 1 : index
      %c0_24 = arith.constant 0 : index
      %43 = memref.load %arg3[%c1_23, %c0_24] : memref<3x6xf32, #tpu.memory_space<smem>>
      %44 = vector.broadcast %43 : f32 to vector<2x1xf32>
      %45 = arith.mulf %42, %44 : vector<2x1xf32>
      %46 = arith.addf %29, %45 : vector<2x1xf32>
      %c1_25 = arith.constant 1 : index
      %c1_26 = arith.constant 1 : index
      %47 = memref.load %arg3[%c1_25, %c1_26] : memref<3x6xf32, #tpu.memory_space<smem>>
      %48 = vector.broadcast %47 : f32 to vector<2x1xf32>
      %49 = arith.mulf %42, %48 : vector<2x1xf32>
      %50 = arith.addf %33, %49 : vector<2x1xf32>
      %c1_27 = arith.constant 1 : index
      %c2_28 = arith.constant 2 : index
      %51 = memref.load %arg3[%c1_27, %c2_28] : memref<3x6xf32, #tpu.memory_space<smem>>
      %52 = vector.broadcast %51 : f32 to vector<2x1xf32>
      %53 = arith.mulf %42, %52 : vector<2x1xf32>
      %54 = arith.addf %37, %53 : vector<2x1xf32>
      %c2_29 = arith.constant 2 : index
      %c0_30 = arith.constant 0 : index
      %55 = tpu.strided_load %arg8[%c2_29, %c0_30] {strides = array<i32: 3, 1>} : memref<6x128xf32, #tpu.memory_space<vmem>>, vector<2x128xf32>
      %cst_31 = arith.constant dense<0.000000e+00> : vector<2xf32>
      %56 = vector.multi_reduction <add>, %55, %cst_31 [1] : vector<2x128xf32> to vector<2xf32>
      %57 = vector.shape_cast %56 : vector<2xf32> to vector<2x1xf32>
      %cst_32 = arith.constant 3.906250e-03 : f32
      %58 = vector.broadcast %cst_32 : f32 to vector<2x1xf32>
      %59 = arith.mulf %57, %58 : vector<2x1xf32>
      %c2_33 = arith.constant 2 : index
      %c0_34 = arith.constant 0 : index
      %60 = memref.load %arg3[%c2_33, %c0_34] : memref<3x6xf32, #tpu.memory_space<smem>>
      %61 = vector.broadcast %60 : f32 to vector<2x1xf32>
      %62 = arith.mulf %59, %61 : vector<2x1xf32>
      %63 = arith.addf %46, %62 : vector<2x1xf32>
      %c2_35 = arith.constant 2 : index
      %c1_36 = arith.constant 1 : index
      %64 = memref.load %arg3[%c2_35, %c1_36] : memref<3x6xf32, #tpu.memory_space<smem>>
      %65 = vector.broadcast %64 : f32 to vector<2x1xf32>
      %66 = arith.mulf %59, %65 : vector<2x1xf32>
      %67 = arith.addf %50, %66 : vector<2x1xf32>
      %c2_37 = arith.constant 2 : index
      %c2_38 = arith.constant 2 : index
      %68 = memref.load %arg3[%c2_37, %c2_38] : memref<3x6xf32, #tpu.memory_space<smem>>
      %69 = vector.broadcast %68 : f32 to vector<2x1xf32>
      %70 = arith.mulf %59, %69 : vector<2x1xf32>
      %71 = arith.addf %54, %70 : vector<2x1xf32>
      %72 = arith.mulf %63, %63 : vector<2x1xf32>
      %73 = arith.mulf %67, %67 : vector<2x1xf32>
      %74 = arith.addf %72, %73 : vector<2x1xf32>
      %75 = arith.mulf %71, %71 : vector<2x1xf32>
      %76 = arith.addf %74, %75 : vector<2x1xf32>
      %77 = math.sqrt %76 : vector<2x1xf32>
      %78 = math.cos %77 : vector<2x1xf32>
      %79 = math.sin %77 : vector<2x1xf32>
      %cst_39 = arith.constant 1.000000e+00 : f32
      %80 = vector.broadcast %cst_39 : f32 to vector<2x1xf32>
      %81 = arith.subf %80, %78 : vector<2x1xf32>
      %cst_40 = arith.constant 9.99999993E-9 : f32
      %82 = vector.broadcast %cst_40 : f32 to vector<2x1xf32>
      %83 = arith.cmpf olt, %77, %82 : vector<2x1xf32>
      %cst_41 = arith.constant 9.99999968E-21 : f32
      %84 = vector.broadcast %cst_41 : f32 to vector<2x1xf32>
      %85 = arith.maximumf %77, %84 : vector<2x1xf32>
      %cst_42 = arith.constant 1.000000e+00 : f32
      %86 = vector.broadcast %cst_42 : f32 to vector<2x1xf32>
      %87 = arith.divf %86, %85 : vector<2x1xf32>
      %cst_43 = arith.constant 0.000000e+00 : f32
      %88 = vector.broadcast %cst_43 : f32 to vector<2x1xf32>
      %89 = arith.select %83, %88, %87 : vector<2x1xi1>, vector<2x1xf32>
      %90 = arith.mulf %63, %89 : vector<2x1xf32>
      %91 = arith.mulf %67, %89 : vector<2x1xf32>
      %92 = arith.mulf %71, %89 : vector<2x1xf32>
      %c0_44 = arith.constant 0 : index
      %c0_45 = arith.constant 0 : index
      %c0_46 = arith.constant 0 : index
      %93 = vector.load %arg6[%c0_44, %c0_45, %c0_46] : memref<1x2x3xf32, #tpu.memory_space<vmem>>, vector<1x2x1xf32>
      %94 = vector.shape_cast %93 : vector<1x2x1xf32> to vector<2x1xf32>
      %c0_47 = arith.constant 0 : index
      %c0_48 = arith.constant 0 : index
      %c1_49 = arith.constant 1 : index
      %95 = vector.load %arg6[%c0_47, %c0_48, %c1_49] : memref<1x2x3xf32, #tpu.memory_space<vmem>>, vector<1x2x1xf32>
      %96 = vector.shape_cast %95 : vector<1x2x1xf32> to vector<2x1xf32>
      %c0_50 = arith.constant 0 : index
      %c0_51 = arith.constant 0 : index
      %c2_52 = arith.constant 2 : index
      %97 = vector.load %arg6[%c0_50, %c0_51, %c2_52] : memref<1x2x3xf32, #tpu.memory_space<vmem>>, vector<1x2x1xf32>
      %98 = vector.shape_cast %97 : vector<1x2x1xf32> to vector<2x1xf32>
      %99 = math.cos %94 : vector<2x1xf32>
      %100 = math.sin %94 : vector<2x1xf32>
      %101 = math.cos %96 : vector<2x1xf32>
      %102 = math.sin %96 : vector<2x1xf32>
      %103 = math.cos %98 : vector<2x1xf32>
      %104 = math.sin %98 : vector<2x1xf32>
      %cst_53 = arith.constant 0.000000e+00 : f32
      %105 = vector.broadcast %cst_53 : f32 to vector<2x1xf32>
      %106 = arith.mulf %101, %103 : vector<2x1xf32>
      %cst_54 = arith.constant 0.000000e+00 : f32
      %107 = vector.broadcast %cst_54 : f32 to vector<2x1xf32>
      %108 = arith.subf %107, %101 : vector<2x1xf32>
      %109 = arith.mulf %108, %104 : vector<2x1xf32>
      %110 = arith.mulf %81, %90 : vector<2x1xf32>
      %111 = arith.mulf %110, %90 : vector<2x1xf32>
      %112 = arith.addf %111, %78 : vector<2x1xf32>
      %113 = arith.mulf %81, %90 : vector<2x1xf32>
      %114 = arith.mulf %113, %91 : vector<2x1xf32>
      %115 = arith.mulf %79, %92 : vector<2x1xf32>
      %116 = arith.subf %114, %115 : vector<2x1xf32>
      %117 = arith.mulf %81, %90 : vector<2x1xf32>
      %118 = arith.mulf %117, %92 : vector<2x1xf32>
      %119 = arith.mulf %79, %91 : vector<2x1xf32>
      %120 = arith.addf %118, %119 : vector<2x1xf32>
      %c0_55 = arith.constant 0 : index
      %c0_56 = arith.constant 0 : index
      %121 = memref.load %arg2[%c0_55, %c0_56] : memref<3x3xf32, #tpu.memory_space<smem>>
      %122 = vector.broadcast %121 : f32 to vector<2x1xf32>
      %123 = arith.mulf %106, %122 : vector<2x1xf32>
      %c1_57 = arith.constant 1 : index
      %c0_58 = arith.constant 0 : index
      %124 = memref.load %arg2[%c1_57, %c0_58] : memref<3x3xf32, #tpu.memory_space<smem>>
      %125 = vector.broadcast %124 : f32 to vector<2x1xf32>
      %126 = arith.mulf %109, %125 : vector<2x1xf32>
      %127 = arith.addf %123, %126 : vector<2x1xf32>
      %c2_59 = arith.constant 2 : index
      %c0_60 = arith.constant 0 : index
      %128 = memref.load %arg2[%c2_59, %c0_60] : memref<3x3xf32, #tpu.memory_space<smem>>
      %129 = vector.broadcast %128 : f32 to vector<2x1xf32>
      %130 = arith.mulf %102, %129 : vector<2x1xf32>
      %131 = arith.addf %127, %130 : vector<2x1xf32>
      %132 = arith.mulf %131, %112 : vector<2x1xf32>
      %133 = arith.addf %105, %132 : vector<2x1xf32>
      %c0_61 = arith.constant 0 : index
      %c1_62 = arith.constant 1 : index
      %134 = memref.load %arg2[%c0_61, %c1_62] : memref<3x3xf32, #tpu.memory_space<smem>>
      %135 = vector.broadcast %134 : f32 to vector<2x1xf32>
      %136 = arith.mulf %106, %135 : vector<2x1xf32>
      %c1_63 = arith.constant 1 : index
      %c1_64 = arith.constant 1 : index
      %137 = memref.load %arg2[%c1_63, %c1_64] : memref<3x3xf32, #tpu.memory_space<smem>>
      %138 = vector.broadcast %137 : f32 to vector<2x1xf32>
      %139 = arith.mulf %109, %138 : vector<2x1xf32>
      %140 = arith.addf %136, %139 : vector<2x1xf32>
      %c2_65 = arith.constant 2 : index
      %c1_66 = arith.constant 1 : index
      %141 = memref.load %arg2[%c2_65, %c1_66] : memref<3x3xf32, #tpu.memory_space<smem>>
      %142 = vector.broadcast %141 : f32 to vector<2x1xf32>
      %143 = arith.mulf %102, %142 : vector<2x1xf32>
      %144 = arith.addf %140, %143 : vector<2x1xf32>
      %145 = arith.mulf %144, %116 : vector<2x1xf32>
      %146 = arith.addf %133, %145 : vector<2x1xf32>
      %c0_67 = arith.constant 0 : index
      %c2_68 = arith.constant 2 : index
      %147 = memref.load %arg2[%c0_67, %c2_68] : memref<3x3xf32, #tpu.memory_space<smem>>
      %148 = vector.broadcast %147 : f32 to vector<2x1xf32>
      %149 = arith.mulf %106, %148 : vector<2x1xf32>
      %c1_69 = arith.constant 1 : index
      %c2_70 = arith.constant 2 : index
      %150 = memref.load %arg2[%c1_69, %c2_70] : memref<3x3xf32, #tpu.memory_space<smem>>
      %151 = vector.broadcast %150 : f32 to vector<2x1xf32>
      %152 = arith.mulf %109, %151 : vector<2x1xf32>
      %153 = arith.addf %149, %152 : vector<2x1xf32>
      %c2_71 = arith.constant 2 : index
      %c2_72 = arith.constant 2 : index
      %154 = memref.load %arg2[%c2_71, %c2_72] : memref<3x3xf32, #tpu.memory_space<smem>>
      %155 = vector.broadcast %154 : f32 to vector<2x1xf32>
      %156 = arith.mulf %102, %155 : vector<2x1xf32>
      %157 = arith.addf %153, %156 : vector<2x1xf32>
      %158 = arith.mulf %157, %120 : vector<2x1xf32>
      %159 = arith.addf %146, %158 : vector<2x1xf32>
      %160 = arith.mulf %100, %102 : vector<2x1xf32>
      %161 = arith.mulf %160, %103 : vector<2x1xf32>
      %162 = arith.mulf %99, %104 : vector<2x1xf32>
      %163 = arith.addf %161, %162 : vector<2x1xf32>
      %cst_73 = arith.constant 0.000000e+00 : f32
      %164 = vector.broadcast %cst_73 : f32 to vector<2x1xf32>
      %165 = arith.subf %164, %100 : vector<2x1xf32>
      %166 = arith.mulf %165, %102 : vector<2x1xf32>
      %167 = arith.mulf %166, %104 : vector<2x1xf32>
      %168 = arith.mulf %99, %103 : vector<2x1xf32>
      %169 = arith.addf %167, %168 : vector<2x1xf32>
      %cst_74 = arith.constant 0.000000e+00 : f32
      %170 = vector.broadcast %cst_74 : f32 to vector<2x1xf32>
      %171 = arith.subf %170, %100 : vector<2x1xf32>
      %172 = arith.mulf %171, %101 : vector<2x1xf32>
      %173 = arith.mulf %81, %90 : vector<2x1xf32>
      %174 = arith.mulf %173, %91 : vector<2x1xf32>
      %175 = arith.mulf %79, %92 : vector<2x1xf32>
      %176 = arith.addf %174, %175 : vector<2x1xf32>
      %177 = arith.mulf %81, %91 : vector<2x1xf32>
      %178 = arith.mulf %177, %91 : vector<2x1xf32>
      %179 = arith.addf %178, %78 : vector<2x1xf32>
      %180 = arith.mulf %81, %91 : vector<2x1xf32>
      %181 = arith.mulf %180, %92 : vector<2x1xf32>
      %182 = arith.mulf %79, %90 : vector<2x1xf32>
      %183 = arith.subf %181, %182 : vector<2x1xf32>
      %c0_75 = arith.constant 0 : index
      %c0_76 = arith.constant 0 : index
      %184 = memref.load %arg2[%c0_75, %c0_76] : memref<3x3xf32, #tpu.memory_space<smem>>
      %185 = vector.broadcast %184 : f32 to vector<2x1xf32>
      %186 = arith.mulf %163, %185 : vector<2x1xf32>
      %c1_77 = arith.constant 1 : index
      %c0_78 = arith.constant 0 : index
      %187 = memref.load %arg2[%c1_77, %c0_78] : memref<3x3xf32, #tpu.memory_space<smem>>
      %188 = vector.broadcast %187 : f32 to vector<2x1xf32>
      %189 = arith.mulf %169, %188 : vector<2x1xf32>
      %190 = arith.addf %186, %189 : vector<2x1xf32>
      %c2_79 = arith.constant 2 : index
      %c0_80 = arith.constant 0 : index
      %191 = memref.load %arg2[%c2_79, %c0_80] : memref<3x3xf32, #tpu.memory_space<smem>>
      %192 = vector.broadcast %191 : f32 to vector<2x1xf32>
      %193 = arith.mulf %172, %192 : vector<2x1xf32>
      %194 = arith.addf %190, %193 : vector<2x1xf32>
      %195 = arith.mulf %194, %176 : vector<2x1xf32>
      %196 = arith.addf %159, %195 : vector<2x1xf32>
      %c0_81 = arith.constant 0 : index
      %c1_82 = arith.constant 1 : index
      %197 = memref.load %arg2[%c0_81, %c1_82] : memref<3x3xf32, #tpu.memory_space<smem>>
      %198 = vector.broadcast %197 : f32 to vector<2x1xf32>
      %199 = arith.mulf %163, %198 : vector<2x1xf32>
      %c1_83 = arith.constant 1 : index
      %c1_84 = arith.constant 1 : index
      %200 = memref.load %arg2[%c1_83, %c1_84] : memref<3x3xf32, #tpu.memory_space<smem>>
      %201 = vector.broadcast %200 : f32 to vector<2x1xf32>
      %202 = arith.mulf %169, %201 : vector<2x1xf32>
      %203 = arith.addf %199, %202 : vector<2x1xf32>
      %c2_85 = arith.constant 2 : index
      %c1_86 = arith.constant 1 : index
      %204 = memref.load %arg2[%c2_85, %c1_86] : memref<3x3xf32, #tpu.memory_space<smem>>
      %205 = vector.broadcast %204 : f32 to vector<2x1xf32>
      %206 = arith.mulf %172, %205 : vector<2x1xf32>
      %207 = arith.addf %203, %206 : vector<2x1xf32>
      %208 = arith.mulf %207, %179 : vector<2x1xf32>
      %209 = arith.addf %196, %208 : vector<2x1xf32>
      %c0_87 = arith.constant 0 : index
      %c2_88 = arith.constant 2 : index
      %210 = memref.load %arg2[%c0_87, %c2_88] : memref<3x3xf32, #tpu.memory_space<smem>>
      %211 = vector.broadcast %210 : f32 to vector<2x1xf32>
      %212 = arith.mulf %163, %211 : vector<2x1xf32>
      %c1_89 = arith.constant 1 : index
      %c2_90 = arith.constant 2 : index
      %213 = memref.load %arg2[%c1_89, %c2_90] : memref<3x3xf32, #tpu.memory_space<smem>>
      %214 = vector.broadcast %213 : f32 to vector<2x1xf32>
      %215 = arith.mulf %169, %214 : vector<2x1xf32>
      %216 = arith.addf %212, %215 : vector<2x1xf32>
      %c2_91 = arith.constant 2 : index
      %c2_92 = arith.constant 2 : index
      %217 = memref.load %arg2[%c2_91, %c2_92] : memref<3x3xf32, #tpu.memory_space<smem>>
      %218 = vector.broadcast %217 : f32 to vector<2x1xf32>
      %219 = arith.mulf %172, %218 : vector<2x1xf32>
      %220 = arith.addf %216, %219 : vector<2x1xf32>
      %221 = arith.mulf %220, %183 : vector<2x1xf32>
      %222 = arith.addf %209, %221 : vector<2x1xf32>
      %cst_93 = arith.constant 0.000000e+00 : f32
      %223 = vector.broadcast %cst_93 : f32 to vector<2x1xf32>
      %224 = arith.subf %223, %99 : vector<2x1xf32>
      %225 = arith.mulf %224, %102 : vector<2x1xf32>
      %226 = arith.mulf %225, %103 : vector<2x1xf32>
      %227 = arith.mulf %100, %104 : vector<2x1xf32>
      %228 = arith.addf %226, %227 : vector<2x1xf32>
      %229 = arith.mulf %99, %102 : vector<2x1xf32>
      %230 = arith.mulf %229, %104 : vector<2x1xf32>
      %231 = arith.mulf %100, %103 : vector<2x1xf32>
      %232 = arith.addf %230, %231 : vector<2x1xf32>
      %233 = arith.mulf %99, %101 : vector<2x1xf32>
      %234 = arith.mulf %81, %90 : vector<2x1xf32>
      %235 = arith.mulf %234, %92 : vector<2x1xf32>
      %236 = arith.mulf %79, %91 : vector<2x1xf32>
      %237 = arith.subf %235, %236 : vector<2x1xf32>
      %238 = arith.mulf %81, %91 : vector<2x1xf32>
      %239 = arith.mulf %238, %92 : vector<2x1xf32>
      %240 = arith.mulf %79, %90 : vector<2x1xf32>
      %241 = arith.addf %239, %240 : vector<2x1xf32>
      %242 = arith.mulf %81, %92 : vector<2x1xf32>
      %243 = arith.mulf %242, %92 : vector<2x1xf32>
      %244 = arith.addf %243, %78 : vector<2x1xf32>
      %c0_94 = arith.constant 0 : index
      %c0_95 = arith.constant 0 : index
      %245 = memref.load %arg2[%c0_94, %c0_95] : memref<3x3xf32, #tpu.memory_space<smem>>
      %246 = vector.broadcast %245 : f32 to vector<2x1xf32>
      %247 = arith.mulf %228, %246 : vector<2x1xf32>
      %c1_96 = arith.constant 1 : index
      %c0_97 = arith.constant 0 : index
      %248 = memref.load %arg2[%c1_96, %c0_97] : memref<3x3xf32, #tpu.memory_space<smem>>
      %249 = vector.broadcast %248 : f32 to vector<2x1xf32>
      %250 = arith.mulf %232, %249 : vector<2x1xf32>
      %251 = arith.addf %247, %250 : vector<2x1xf32>
      %c2_98 = arith.constant 2 : index
      %c0_99 = arith.constant 0 : index
      %252 = memref.load %arg2[%c2_98, %c0_99] : memref<3x3xf32, #tpu.memory_space<smem>>
      %253 = vector.broadcast %252 : f32 to vector<2x1xf32>
      %254 = arith.mulf %233, %253 : vector<2x1xf32>
      %255 = arith.addf %251, %254 : vector<2x1xf32>
      %256 = arith.mulf %255, %237 : vector<2x1xf32>
      %257 = arith.addf %222, %256 : vector<2x1xf32>
      %c0_100 = arith.constant 0 : index
      %c1_101 = arith.constant 1 : index
      %258 = memref.load %arg2[%c0_100, %c1_101] : memref<3x3xf32, #tpu.memory_space<smem>>
      %259 = vector.broadcast %258 : f32 to vector<2x1xf32>
      %260 = arith.mulf %228, %259 : vector<2x1xf32>
      %c1_102 = arith.constant 1 : index
      %c1_103 = arith.constant 1 : index
      %261 = memref.load %arg2[%c1_102, %c1_103] : memref<3x3xf32, #tpu.memory_space<smem>>
      %262 = vector.broadcast %261 : f32 to vector<2x1xf32>
      %263 = arith.mulf %232, %262 : vector<2x1xf32>
      %264 = arith.addf %260, %263 : vector<2x1xf32>
      %c2_104 = arith.constant 2 : index
      %c1_105 = arith.constant 1 : index
      %265 = memref.load %arg2[%c2_104, %c1_105] : memref<3x3xf32, #tpu.memory_space<smem>>
      %266 = vector.broadcast %265 : f32 to vector<2x1xf32>
      %267 = arith.mulf %233, %266 : vector<2x1xf32>
      %268 = arith.addf %264, %267 : vector<2x1xf32>
      %269 = arith.mulf %268, %241 : vector<2x1xf32>
      %270 = arith.addf %257, %269 : vector<2x1xf32>
      %c0_106 = arith.constant 0 : index
      %c2_107 = arith.constant 2 : index
      %271 = memref.load %arg2[%c0_106, %c2_107] : memref<3x3xf32, #tpu.memory_space<smem>>
      %272 = vector.broadcast %271 : f32 to vector<2x1xf32>
      %273 = arith.mulf %228, %272 : vector<2x1xf32>
      %c1_108 = arith.constant 1 : index
      %c2_109 = arith.constant 2 : index
      %274 = memref.load %arg2[%c1_108, %c2_109] : memref<3x3xf32, #tpu.memory_space<smem>>
      %275 = vector.broadcast %274 : f32 to vector<2x1xf32>
      %276 = arith.mulf %232, %275 : vector<2x1xf32>
      %277 = arith.addf %273, %276 : vector<2x1xf32>
      %c2_110 = arith.constant 2 : index
      %c2_111 = arith.constant 2 : index
      %278 = memref.load %arg2[%c2_110, %c2_111] : memref<3x3xf32, #tpu.memory_space<smem>>
      %279 = vector.broadcast %278 : f32 to vector<2x1xf32>
      %280 = arith.mulf %233, %279 : vector<2x1xf32>
      %281 = arith.addf %277, %280 : vector<2x1xf32>
      %282 = arith.mulf %281, %244 : vector<2x1xf32>
      %283 = arith.addf %270, %282 : vector<2x1xf32>
      %cst_112 = arith.constant 1.000000e+00 : f32
      %284 = vector.broadcast %cst_112 : f32 to vector<2x1xf32>
      %285 = arith.subf %283, %284 : vector<2x1xf32>
      %cst_113 = arith.constant 5.000000e-01 : f32
      %286 = vector.broadcast %cst_113 : f32 to vector<2x1xf32>
      %287 = arith.mulf %286, %285 : vector<2x1xf32>
      %cst_114 = arith.constant -9.990000e-01 : f32
      %cst_115 = arith.constant 9.990000e-01 : f32
      %288 = vector.broadcast %cst_114 : f32 to vector<2x1xf32>
      %289 = arith.maximumf %288, %287 : vector<2x1xf32>
      %290 = vector.broadcast %cst_115 : f32 to vector<2x1xf32>
      %291 = arith.minimumf %290, %289 : vector<2x1xf32>
      %292 = math.absf %291 : vector<2x1xf32>
      %cst_116 = arith.constant -0.0012624911 : f32
      %293 = vector.broadcast %cst_116 : f32 to vector<2x1xf32>
      %294 = arith.mulf %293, %292 : vector<2x1xf32>
      %cst_117 = arith.constant 6.670090e-03 : f32
      %295 = vector.broadcast %cst_117 : f32 to vector<2x1xf32>
      %296 = arith.addf %294, %295 : vector<2x1xf32>
      %297 = arith.mulf %296, %292 : vector<2x1xf32>
      %cst_118 = arith.constant -0.0170881264 : f32
      %298 = vector.broadcast %cst_118 : f32 to vector<2x1xf32>
      %299 = arith.addf %297, %298 : vector<2x1xf32>
      %300 = arith.mulf %299, %292 : vector<2x1xf32>
      %cst_119 = arith.constant 0.0308918804 : f32
      %301 = vector.broadcast %cst_119 : f32 to vector<2x1xf32>
      %302 = arith.addf %300, %301 : vector<2x1xf32>
      %303 = arith.mulf %302, %292 : vector<2x1xf32>
      %cst_120 = arith.constant -0.0501743034 : f32
      %304 = vector.broadcast %cst_120 : f32 to vector<2x1xf32>
      %305 = arith.addf %303, %304 : vector<2x1xf32>
      %306 = arith.mulf %305, %292 : vector<2x1xf32>
      %cst_121 = arith.constant 0.0889789909 : f32
      %307 = vector.broadcast %cst_121 : f32 to vector<2x1xf32>
      %308 = arith.addf %306, %307 : vector<2x1xf32>
      %309 = arith.mulf %308, %292 : vector<2x1xf32>
      %cst_122 = arith.constant -0.214598805 : f32
      %310 = vector.broadcast %cst_122 : f32 to vector<2x1xf32>
      %311 = arith.addf %309, %310 : vector<2x1xf32>
      %312 = arith.mulf %311, %292 : vector<2x1xf32>
      %cst_123 = arith.constant 1.57079625 : f32
      %313 = vector.broadcast %cst_123 : f32 to vector<2x1xf32>
      %314 = arith.addf %312, %313 : vector<2x1xf32>
      %cst_124 = arith.constant 1.000000e+00 : f32
      %315 = vector.broadcast %cst_124 : f32 to vector<2x1xf32>
      %316 = arith.subf %315, %292 : vector<2x1xf32>
      %cst_125 = arith.constant 0.000000e+00 : f32
      %317 = vector.broadcast %cst_125 : f32 to vector<2x1xf32>
      %318 = arith.maximumf %316, %317 : vector<2x1xf32>
      %319 = math.sqrt %318 : vector<2x1xf32>
      %320 = arith.mulf %319, %314 : vector<2x1xf32>
      %cst_126 = arith.constant 0.000000e+00 : f32
      %321 = vector.broadcast %cst_126 : f32 to vector<2x1xf32>
      %322 = arith.cmpf oge, %291, %321 : vector<2x1xf32>
      %cst_127 = arith.constant 3.14159274 : f32
      %323 = vector.broadcast %cst_127 : f32 to vector<2x1xf32>
      %324 = arith.subf %323, %320 : vector<2x1xf32>
      %325 = arith.select %322, %320, %324 : vector<2x1xi1>, vector<2x1xf32>
      %326 = arith.mulf %325, %325 : vector<2x1xf32>
      %c0_128 = arith.constant 0 : index
      %c0_129 = arith.constant 0 : index
      %c0_130 = arith.constant 0 : index
      %327 = vector.load %arg7[%c0_128, %c0_129, %c0_130] : memref<1x2x1xf32, #tpu.memory_space<vmem>>, vector<1x2x1xf32>
      %328 = vector.shape_cast %327 : vector<1x2x1xf32> to vector<2x1xf32>
      %329 = vector.shape_cast %326 : vector<2x1xf32> to vector<1x2x1xf32>
      tpu.vector_store %arg7[%c0_128, %c0_129, %c0_130], %329 {strides = array<i32>} : memref<1x2x1xf32, #tpu.memory_space<vmem>>, vector<1x2x1xf32>,
    } else {
    }
    return
  }
  func.func @transform_0(%arg0: i32, %arg1: i32) -> (i32, i32) {
    %c0_i32 = arith.constant 0 : i32
    %c0_i32_0 = arith.constant 0 : i32
    %c0_i32_1 = arith.constant 0 : i32
    return %c0_i32, %c0_i32_0 : i32, i32
  }
  func.func @transform_1(%arg0: i32, %arg1: i32) -> (i32, i32) {
    %c0_i32 = arith.constant 0 : i32
    %c0_i32_0 = arith.constant 0 : i32
    %c0_i32_1 = arith.constant 0 : i32
    return %c0_i32, %c0_i32_0 : i32, i32
  }
  func.func @transform_2(%arg0: i32, %arg1: i32) -> i32 {
    %c0_i32 = arith.constant 0 : i32
    %c0_i32_0 = arith.constant 0 : i32
    return %c0_i32 : i32
  }
  func.func @transform_3(%arg0: i32, %arg1: i32) -> (i32, i32, i32) {
    %c0_i32 = arith.constant 0 : i32
    %c0_i32_0 = arith.constant 0 : i32
    return %arg0, %c0_i32, %arg1 : i32, i32, i32
  }
  func.func @transform_4(%arg0: i32, %arg1: i32) -> (i32, i32, i32) {
    %c0_i32 = arith.constant 0 : i32
    %c0_i32_0 = arith.constant 0 : i32
    %c0_i32_1 = arith.constant 0 : i32
    return %arg0, %c0_i32, %c0_i32_0 : i32, i32, i32
  }
  func.func @transform_5(%arg0: i32, %arg1: i32) -> (i32, i32, i32) {
    %c0_i32 = arith.constant 0 : i32
    %c0_i32_0 = arith.constant 0 : i32
    %c0_i32_1 = arith.constant 0 : i32
    return %arg0, %c0_i32, %c0_i32_0 : i32, i32, i32
  }
}

</mosaic_0001>

<bundles_post_ra>
// kernel: tpu_custom_call.1
= control target key start
LH: loop header
LB: loop body
LE: loop exit
PB: predicated region body
PF: predicated region fallthrough
CT: control target
= control target key end

     0   :  { %10 = vsyncpa [#allocation4], 0  ;;  %s1750_s0 = inlined_call_operand.vmem [shape: f32[3,3], index: 0, kind: input, shape index: {}]   ;;  %s1751_s1 = inlined_call_operand.vmem [shape: f32[3,6], index: 1, kind: input, shape index: {}]   ;;  %s1752_s2 = inlined_call_operand.vmem [shape: f32[6], index: 2, kind: input, shape index: {}]   ;;  %s1753_s3 = inlined_call_operand.vmem [shape: f32[2,6,256], index: 3, kind: input, shape index: {}]   ;;  %s1754_s4 = inlined_call_operand.vmem [shape: f32[2,2,3], index: 4, kind: input, shape index: {}]   ;;  %s1755_s5 = inlined_call_operand.vmem [shape: f32[2,2,1], index: 5, kind: output, shape index: {}]  }
   0x1   :  { %11 = vsyncpa [#allocation6], 0  ;;  %s1421_s18 = smov 0   ;;  %s1423_s19 = smov 0  }
   0x2   :  { %s1425_s20 = smov 0   ;;  %s1427_s21 = smov 0  }
   0x3   :  { %s1429_s22 = smov 0  }
   0x4 LB: > { %s201_s25 = sshll.u32 %s1751_s1, 4  ;;  %s1127_s26 = sadd.s32 4294967295, %s1376_s22   ;;  %s1376_s22 = sphi %s1429_s22, %s17_s22   ;;  %s1372_s21 = sphi %s1427_s21, %s1768_s21   ;;  %s1368_s20 = sphi %s1425_s20, %s1767_s20   ;;  %s1364_s19 = sphi %s1423_s19, %s1766_s19   ;;  %s1360_s18 = sphi %s1421_s18, %s1765_s18   ;;  %s202_s25 = int_to_ptr.vmem [resolvable:$true] %s201_s25 }
   0x5   : > { %p1129_p0 = scmp.ge.s32.totalorder %s1376_s22, 1  ;;  %p177_p1 = scmp.lt.s32.totalorder %s1376_s22, 5 }
   0x6   : > { %p1452_p2 = scmp.eq.s32.totalorder %s1127_s26, 0  ;;  %s26_s30 = sadd.s32 1, %s1368_s20 }
   0x7   : > { %p1456_p3 = pnand %p1129_p0, %p177_p1  ;;  %p1469_p6 = scmp.ge.s32.totalorder %s26_s30, 2 }
   0x8   : > { %s1759_s27 = scalar_select %p1452_p2, 1, 0 }
   0x9   : > { %s1760_s28 = scalar_select %p1456_p3, 1, 0 }
   0xa   : > { %p1202_p4 = pneg %p1456_p3  ;;  %s1285_s7 = scalar_lea.vmem %s202_s25, 64 }
   0xb   : > { %p1286_p7 = scmp.ne.s32.totalorder %s202_s25, %s1285_s7  ;;  %p1293_p11 = scmp.lt.s32.totalorder %s202_s25, %s202_s25 }
   0xc   : > { %p1464_p5 = pnand %p1452_p2, %p1202_p4  ;;  %p1294_p12 = scmp.lt.s32.totalorder %s1285_s7, %s1285_s7 }
   0xe   : > { %p1287_p8 = pneg %p1464_p5  ;;  %p1295_p13 = por %p1294_p12, %p1293_p11 }
  0x10   : > { %p1288_p9 = pnand %p1287_p8, %p1286_p7 }
  0x12   : > { %p1289_p10 = pneg %p1288_p9 }
  0x14   : > { %p1296_p0 = pnand %p1295_p13, %p1289_p10 }
  0x16   : > { %1299 = shalt.err (!%p1296_p0)
}
  0x17   : > { %s1378_s8 = smov [#allocation5]   ;;  %s1770_s30 = smov (%p1469_p6, %s26_s30), 0 }
  0x18   : > { %1208 = dma.vmem_to_smem (!%p1464_p5), %s202_s25, 64, %s1378_s8, [#allocation6]  }
  0x19   : > { %s29_s9 = sadd.s32 1, %s1372_s21  ;;  %s190_s12 = sshll.u32 %s1750_s0, 4  ;;  %s191_s12 = int_to_ptr.vmem [resolvable:$true] %s190_s12 }
  0x1a   : > { %s1772_s9 = smov (!%p1469_p6, %s29_s9), %s1372_s21  ;;  %s212_s15 = sshll.u32 %s1752_s2, 4  ;;  %s213_s15 = int_to_ptr.vmem [resolvable:$true] %s212_s15 }
  0x1b   : > { %p31_p1 = scmp.ge.s32.totalorder %s1772_s9, 2  ;;  %s1300_s16 = scalar_lea.vmem %s191_s12, 64 }
  0x1c   : > { %p1301_p4 = scmp.ne.s32.totalorder %s191_s12, %s1300_s16  ;;  %p1308_p10 = scmp.lt.s32.totalorder %s191_s12, %s191_s12 }
  0x1d   : > { %p1309_p11 = scmp.lt.s32.totalorder %s1300_s16, %s1300_s16 }
  0x1e   : > { %p1303_p7 = pnand %p1301_p4, %p1287_p8 }
  0x1f   : > { %p1310_p12 = por %p1309_p11, %p1308_p10 }
  0x20   : > { %p1304_p9 = pneg %p1303_p7 }
  0x22   : > { %p1311_p13 = pnand %p1310_p12, %p1304_p9 }
  0x24   : > { %1314 = shalt.err (!%p1311_p13)
}
  0x25   : > { %s1379_s17 = smov [#allocation3]   ;;  %s1774_s9 = smov (%p31_p1, %s1772_s9), 0 }
  0x26   : > { %1205 = dma.vmem_to_smem (!%p1464_p5), %s191_s12, 64, %s1379_s17, [#allocation4]  }
  0x27   : > { %s1315_s23 = scalar_lea.vmem %s213_s15, 16  ;;  %p1323_p7 = scmp.lt.s32.totalorder %s213_s15, %s213_s15 }
  0x28   : > { %p1316_p6 = scmp.ne.s32.totalorder %s213_s15, %s1315_s23  ;;  %p1324_p2 = scmp.lt.s32.totalorder %s1315_s23, %s1315_s23 }
  0x2a   : > { %p1318_p0 = pnand %p1316_p6, %p1287_p8  ;;  %p1325_p3 = por %p1324_p2, %p1323_p7 }
  0x2c   : > { %p1319_p4 = pneg %p1318_p0 }
  0x2e   : > { %p1326_p10 = pnand %p1325_p3, %p1319_p4 }
  0x30   : > { %1329 = shalt.err (!%p1326_p10)
}
  0x31   : > { %s1380_s24 = smov [#allocation7]   ;;  %p1763_p9 = scmp.ne.s32.totalorder %s1760_s28, 0 }
  0x32   : > { %1211 = dma.vmem_to_smem (!%p1464_p5), %s213_s15, 16, %s1380_s24, [#allocation6]  }
  0x33   : > { %243 = sbr.rel (%p1763_p9) target bundleno = 637 (0x27d), region = 40  ;;  %p1764_p1 = scmp.ne.s32.totalorder (!%p1763_p9), %s1759_s27, 0 }
  0x3a   : > { %1351 = dma.done.wait (%p1764_p1), [#allocation4], 64  }
  0x3b   : > { %1353 = vsyncadd (%p1764_p1), [#allocation4], 4294967232 }
  0x3c   : > { %1355 = dma.done.wait (%p1764_p1), [#allocation6], 80  }
  0x3d   : > { %1357 = vsyncadd (%p1764_p1), [#allocation6], 4294967216 }
  0x3e   : > { %257 = sfence }
  0x3f   : > { %p286_p2 = scmp.lt.s32.totalorder %s1364_s19, 1  ;;  %p288_p3 = scmp.lt.s32.totalorder %s1360_s18, 1 }
  0x40   : > { %p1142_p5 = scmp.ne.s32.totalorder %s1360_s18, 0 }
  0x41   : > { %s1776_s19 = smov (!%p286_p2, %s1364_s19), 1  ;;  %v1381_v0 = vmov (!%p1142_p5), 0.0  }
  0x42   : > { %s289_s25 = scalar_select %p288_p3, %s1360_s18, 1 }
  0x43   : > { %s1520_s26 = sshll.u32 %s1776_s19, 1  ;;  %305 = sbr.rel (%p1142_p5) target bundleno = 74 (0x4a), region = 56  ;;  %306 = vst [vmem:[#allocation2] sm:$0x3f] (!%p1142_p5), %v1381_v0 }
  0x44   : > { %s291_s28 = sadd.s32 %s1520_s26, %s289_s25  ;;  %s297_s27 = scalar_lea.vmem %s1754_s4, %s1520_s26 }
  0x45   : > { %s1139_s7 = sshll.u32 %s291_s28, 3  ;;  %s301_s11 = scalar_lea.vmem %s1755_s5, %s1520_s26 }
  0x46   : > { %s293_s14 = scalar_lea.vmem %s1753_s3, %s1139_s7 }
  0x4a PF: > { %v307_v1 = vld [vmem:[#allocation2] sm:$0x3f]  ;;  %p1143_p8 = scmp.ne.s32.totalorder %s1360_s18, 1 }
  0x4b   : > { %v308_v2 = vld [vmem:[%s293_s14] sm:$0x3f]  ;;  %vm325_vm0 = vcmask (!%p1143_p8), 1041408   ;;  %v1382_v22 = vmov (!%p1143_p8), 683565275   ;;  %s1388_s18 = smov (!%p1143_p8), 127  }
  0x4c   : > { %v309_v3 = vadd.f32 %v308_v2, %v307_v1  ;;  %314 = sbr.rel (%p1143_p8) target bundleno = 637 (0x27d), region = 60  ;;  %v1536_v10 = vld [vmem:[%s297_s27] sm:$0x3] (!%p1143_p8)  ;;  %v1383_v24 = vmov (!%p1143_p8), 2475754826   ;;  %s1389_s19 = smov (!%p1143_p8), 126  }
  0x4d   : > { %v610_v11 = vand.u32 (!%p1143_p8), 2139095040, %v1536_v10  ;;  %v607_v13 = vand.u32 (!%p1143_p8), 2147483647, %v1536_v10  ;;  %v1384_v26 = vmov (!%p1143_p8), 2131351028   ;;  %vm609_vm8 = vcmp.lt.s32.totalorder (!%p1143_p8), %v1536_v10, 0 }
  0x4e   : > { %310 = vst [vmem:[#allocation2] sm:$0x3f] %v309_v3  ;;  %v1385_v28 = vmov (!%p1143_p8), 2102212464   ;;  %v1386_v30 = vmov (!%p1143_p8), 920167782  }
  0x4f   : > { %v611_v12 = vshrl.u32 (!%p1143_p8), %v610_v11, 23  ;;  %v614_v16 = vand.u32 (!%p1143_p8), 8388607, %v607_v13  ;;  %v1387_v37 = vmov (!%p1143_p8), 1326507024   ;;  %s330_s15 = sld [smem:[#allocation5]] (!%p1143_p8) }
  0x50   : > { %vm608_vm9 = vcmp.le.f32.partialorder (!%p1143_p8), %v607_v13, 0.7853982  ;;  %s1146_s16 = sld [smem:[#allocation5 + $0x1]] (!%p1143_p8)  ;;  %s1147_s17 = sld [smem:[#allocation5 + $0x2]] (!%p1143_p8) }
  0x51   : > { %v1162_v14 = vadd.s32 (!%p1143_p8), 4294967169, %v611_v12  ;;  %v615_v19 = vor.u32 (!%p1143_p8), 8388608, %v614_v16  ;;  %s315_s23 = sld [smem:[#allocation7]] (!%p1143_p8)  ;;  %s1144_s24 = sld [smem:[#allocation7 + $0x1]] (!%p1143_p8) }
  0x52   : > { %s1145_s25 = sld [smem:[#allocation7 + $0x2]] (!%p1143_p8)  ;;  %s1151_s28 = sld [smem:[#allocation5 + $0x100]] (!%p1143_p8) }
  0x53   : > { %v617_v15 = vadd.s32 1, %v1162_v14  ;;  %v655_v39 = vshll.u32 %v615_v19, 8  ;;  %s1152_s29 = sld [smem:[#allocation5 + $0x101]]  ;;  %s1148_s6 = sld [smem:[#allocation5 + $0x80]] }
  0x54   : > { %s1149_s27 = sld [smem:[#allocation5 + $0x81]]  ;;  %s1150_s7 = sld [smem:[#allocation5 + $0x82]] }
  0x55   : > { %v324_v4 = vld [vmem:[#allocation2] ss:$3 sm:$0x3]  ;;  %v343_v6 = vld [vmem:[#allocation2 + $0x1] ss:$3 sm:$0x3] }
  0x56   : > { %v326_v5 = vsel %vm325_vm0, %v324_v4, 0.0  ;;  %v361_v7 = vld [vmem:[#allocation2 + $0x2] ss:$3 sm:$0x3]  ;;  %v344_v8 = vsel %vm325_vm0, %v343_v6, 0.0  ;;  %vm618_vm1 = vcmp.gt.s32.totalorder %v617_v15, 0 }
  0x57   : > { %327 = vadd.xlane.f32.xlu0 %v326_v5  ;;  %v362_v9 = vsel %vm325_vm0, %v361_v7, 0.0  ;;  %v619_v17 = vsel %vm618_vm1, %v617_v15, 0  ;;  %vm699_vm0 = vweird.f32 %v1536_v10  ;;  %s1153_s8 = sld [smem:[#allocation5 + $0x102]]  ;;  %s1607_s10 = sld [smem:[#allocation3 + $0x81]] }
  0x58   : > { %363 = vadd.xlane.f32.xlu1 %v362_v9  ;;  %v621_v18 = vand.u32 31, %v619_v17  ;;  %v620_v20 = vshrl.u32 %v619_v17, 5  ;;  %s1170_s12 = sld [smem:[#allocation3 + $0x80]]  ;;  %s1176_s13 = sld [smem:[#allocation3 + $0x82]] }
  0x59   : > { %s1172_s14 = sld [smem:[#allocation3 + $0x1]] }
  0x5a   : > { %v622_v21 = vsub.s32 32, %v621_v18  ;;  %v624_v23 = vshll.u32 %v1382_v22, %v621_v18  ;;  %v627_v25 = vshll.u32 %v1383_v24, %v621_v18  ;;  %v630_v27 = vshll.u32 %v1384_v26, %v621_v18 }
  0x5b   : > { %345 = vadd.xlane.f32.xlu0 %v344_v8  ;;  %v633_v29 = vshll.u32 %v1385_v28, %v621_v18  ;;  %v636_v31 = vshll.u32 %v1386_v30, %v621_v18  ;;  %vm639_vm2 = vcmp.lt.s32.totalorder %v620_v20, 1  ;;  %vm642_vm3 = vcmp.lt.s32.totalorder %v620_v20, 4 }
  0x5c   : > { %v623_v32 = vshrl.u32 %v1382_v22, %v622_v21  ;;  %v625_v33 = vshrl.u32 %v1383_v24, %v622_v21  ;;  %v628_v34 = vshrl.u32 %v1384_v26, %v622_v21  ;;  %v631_v35 = vshrl.u32 %v1385_v28, %v622_v21 }
  0x5d   : > { %v634_v36 = vshrl.u32 %v1386_v30, %v622_v21  ;;  %v637_v38 = vshrl.u32 %v1387_v37, %v622_v21  ;;  %vm640_vm4 = vcmp.lt.s32.totalorder %v620_v20, 2  ;;  %vm641_vm5 = vcmp.lt.s32.totalorder %v620_v20, 3 }
  0x5e   : > { %v626_v40 = vor.u32 %v625_v33, %v624_v23  ;;  %v629_v41 = vor.u32 %v628_v34, %v627_v25  ;;  %v632_v42 = vor.u32 %v631_v35, %v630_v27 }
  0x5f   : > { %v635_v43 = vor.u32 %v634_v36, %v633_v29  ;;  %v638_v44 = vor.u32 %v637_v38, %v636_v31 }
  0x60   : > { %v643_v45 = vsel %vm639_vm2, %v623_v32, %v626_v40  ;;  %v644_v46 = vsel %vm642_vm3, %v632_v42, 2102212464  ;;  %v647_v47 = vsel %vm639_vm2, %v626_v40, %v629_v41  ;;  %v651_v48 = vsel %vm639_vm2, %v629_v41, %v632_v42 }
  0x61   : > { %v645_v49 = vsel %vm641_vm5, %v629_v41, %v644_v46  ;;  %v648_v50 = vsel %vm642_vm3, %v635_v43, 920167782  ;;  %v652_v51 = vsel %vm642_vm3, %v638_v44, 1326507024 }
  0x62   : > { %v649_v52 = vsel %vm641_vm5, %v632_v42, %v648_v50  ;;  %v653_v53 = vsel %vm641_vm5, %v635_v43, %v652_v51  ;;  %v646_v54 = vsel %vm640_vm4, %v643_v45, %v645_v49  ;;  %v335_v50 = vstv %s1146_s16  ;;  %s1171_s16 = sld [smem:[#allocation3 + $0x100]] }
  0x63   : > { %v650_v55 = vsel %vm640_vm4, %v647_v47, %v649_v52  ;;  %v654_v56 = vsel %vm640_vm4, %v651_v48, %v653_v53  ;;  %v662_v61 = vmul.u32 %v655_v39, %v646_v54  ;;  %v339_v51 = vstv %s1147_s17  ;;  %s1174_s17 = sld [smem:[#allocation3 + $0x101]] }
  0x64   : > { %v1553_v57 = vmul.u32.u64.low %v655_v39, %v654_v56  ;;  %v1554_v58 = vmul.u32.u64.high %v655_v39, %v654_v56, %v1553_v57  ;;  %v1556_v59 = vmul.u32.u64.low %v655_v39, %v650_v55  ;;  %v1557_v60 = vmul.u32.u64.high %v655_v39, %v650_v55, %v1556_v59 }
  0x65   : > { %v316_v53 = vstv %s315_s23  ;;  %v319_v55 = vstv %s1144_s24  ;;  %v322_v56 = vstv %s1145_s25  ;;  %v367_v57 = vstv %s1151_s28  ;;  %s1177_s23 = sld [smem:[#allocation3 + $0x102]]  ;;  %s1390_s24 = smov 1  }
  0x66   : > { %vm664_vm6 = vc.u32 %v1554_v58, %v1556_v59  ;;  %v665_v62 = vadd.s32 1, %v1557_v60  ;;  %v663_v9 = vadd.s32 %v1556_v59, %v1554_v58  ;;  %v371_v58 = vstv %s1152_s29 }
  0x68   : > { %v666_v63 = vsel %vm664_vm6, %v665_v62, %v1557_v60 }
  0x69   : > { %v667_v0 = vadd.s32 %v666_v63, %v662_v61 }
  0x6b   : > { %v668_v1 = vadd.s32 536870912, %v667_v0 }
  0x6d   : > { %v669_v2 = vshrl.u32 %v668_v1, 30  ;;  %v353_v1 = vstv %s1149_s27 }
  0x6f   : > { %v670_v3 = vshll.u32 %v669_v2, 30  ;;  %v693_v25 = vsub.s32 4, %v669_v2 }
  0x71   : > { %v671_v4 = vsub.s32 %v667_v0, %v670_v3  ;;  %v694_v31 = vsel %vm609_vm8, %v693_v25, %v669_v2  ;;  %v349_v0 = vstv %s1148_s6  ;;  %v357_v2 = vstv %s1150_s7 }
  0x72   : > { %v696_v34 = vsel %vm608_vm9, 0, %v694_v31 }
  0x73   : > { %v673_v5 = vsub.s32 0, %v671_v4  ;;  %v803_v35 = vadd.s32 3, %v696_v34  ;;  %v700_v38 = vand.u32 3, %v696_v34 }
  0x75   : > { %v1163_v6 = vmin.u32 %v673_v5, %v671_v4  ;;  %v804_v36 = vand.u32 3, %v803_v35  ;;  %vm705_vm11 = vcmp.eq.s32.totalorder %v700_v38, 2  ;;  %vm702_vm13 = vcmp.eq.s32.totalorder %v700_v38, 0 }
  0x76   : > { %vm701_vm15 = vcmp.lt.s32.totalorder %v700_v38, 2 }
  0x77   : > { %v675_v7 = vclz %v1163_v6  ;;  %vm809_vm10 = vcmp.eq.s32.totalorder %v804_v36, 2  ;;  %vm806_vm12 = vcmp.eq.s32.totalorder %v804_v36, 0  ;;  %vm805_vm14 = vcmp.lt.s32.totalorder %v804_v36, 2 }
  0x79   : > { %v1164_v8 = vadd.s32 4294967294, %v675_v7 }
  0x7b   : > { %vm1165_vm7 = vcmp.lt.s32.totalorder %v1164_v8, 0 }
  0x7c   : > { %v678_v11 = vsel %vm1165_vm7, 0, %v1164_v8 }
  0x7d   : > { %v679_v12 = vsub.s32 32, %v678_v11  ;;  %v680_v14 = vshll.u32 %v671_v4, %v678_v11  ;;  %v683_v15 = vsub.s32 4294967266, %v678_v11  ;;  %v375_v4 = vstv %s1153_s8 }
  0x7f   : > { %v681_v16 = vshrl.u32 %v663_v9, %v679_v12  ;;  %v684_v17 = vadd.s32 127, %v683_v15 }
  0x81   : > { %v682_v18 = vor.u32 %v681_v16, %v680_v14  ;;  %v685_v19 = vshll.u32 %v684_v17, 23 }
  0x83   : > { %v686_v20 = vor.u32 4788187, %v685_v19  ;;  %v689_v21 = vcvt.s32.f32 %v682_v18 }
  0x85   : > { %v687_v23 = vand.u32 2147483647, %v686_v20 }
  0x87   : > { %v690_v27 = vmul.f32 %v689_v21, %v687_v23 }
  0x89   : > { %v691_v29 = vxor.u32 2147483648, %v690_v27 }
  0x8b   : > { %v692_v32 = vsel %vm609_vm8, %v691_v29, %v690_v27 }
  0x8c   : > { %v695_v33 = vsel %vm608_vm9, %v1536_v10, %v692_v32  ;;  %v331_v10 = vstv %s330_s15  ;;  %s1175_s15 = sld [smem:[#allocation3 + $0x2]] }
  0x8d   : > { %1271 = vcosq.f32 %v695_v33 }
  0x8e   : > { %1273 = vsinq.f32 %v695_v33 }
  0x97   : > { %v1272_v39 = vpop.eup %1271 }
  0x98   : > { %v1274_v40 = vpop.eup %1273  ;;  %v706_v41 = vxor.u32 2147483648, %v1272_v39 }
  0x99   : > { %v703_v42 = vxor.u32 2147483648, %v1274_v40 }
  0x9a   : > { %v811_v13 = vsel %vm809_vm10, %v706_v41, %v1274_v40  ;;  %v707_v43 = vsel %vm705_vm11, %v706_v41, %v1274_v40 }
  0x9b   : > { %v808_v44 = vsel %vm806_vm12, %v1272_v39, %v703_v42  ;;  %v704_v45 = vsel %vm702_vm13, %v1272_v39, %v703_v42 }
  0x9c   : > { %v812_v46 = vsel %vm805_vm14, %v808_v44, %v811_v13  ;;  %v708_v47 = vsel %vm701_vm15, %v704_v45, %v707_v43 }
  0x9d   : > { %v1568_v48 = vsel %vm699_vm0, nan, %v812_v46  ;;  %v1570_v49 = vsel %vm699_vm0, nan, %v708_v47 }
  0x9e   : > { %821 = vrot.lane.b32.xlu1 %v1568_v48, %s1388_s18  ;;  %874 = vrot.lane.b32.xlu0 %v1570_v49, %s1389_s19 }
  0xa2   : > { %878 = vrot.lane.b32.xlu1 %v1568_v48, %s1389_s19  ;;  %s834_s19 = sld [smem:[#allocation3]] }
  0xa6   : > { %815 = vrot.lane.b32.xlu1 %v1570_v49, %s1388_s18 }
  0xe4   : > { %v328_v52 = vpop.xlane.xlu0 %327 }
  0xe5   : > { %v329_v54 = vmul.f32 0.00390625, %v328_v52  ;;  %v364_v59 = vpop.xlane.xlu1 %363 }
  0xe6   : > { %v365_v63 = vmul.f32 0.00390625, %v364_v59 }
  0xe7   : > { %v332_v60 = vmul.f32 %v331_v10, %v329_v54  ;;  %v336_v61 = vmul.f32 %v335_v50, %v329_v54  ;;  %v340_v62 = vmul.f32 %v339_v51, %v329_v54 }
  0xe8   : > { %v346_v3 = vpop.xlane.xlu0 %345  ;;  %v368_v9 = vmul.f32 %v367_v57, %v365_v63  ;;  %v372_v11 = vmul.f32 %v371_v58, %v365_v63  ;;  %v376_v16 = vmul.f32 %v375_v4, %v365_v63  ;;  %v819_v58 = vsub.f32 0.0, %v1570_v49 }
  0xe9   : > { %v333_v5 = vadd.f32 %v332_v60, %v316_v53  ;;  %v347_v6 = vmul.f32 0.00390625, %v346_v3  ;;  %v337_v7 = vadd.f32 %v336_v61, %v319_v55  ;;  %v341_v8 = vadd.f32 %v340_v62, %v322_v56 }
  0xeb   : > { %v350_v12 = vmul.f32 %v349_v0, %v347_v6  ;;  %v354_v14 = vmul.f32 %v353_v1, %v347_v6  ;;  %v358_v15 = vmul.f32 %v357_v2, %v347_v6 }
  0xed   : > { %v351_v17 = vadd.f32 %v350_v12, %v333_v5  ;;  %v355_v18 = vadd.f32 %v354_v14, %v337_v7  ;;  %v359_v19 = vadd.f32 %v358_v15, %v341_v8 }
  0xef   : > { %v1578_v20 = vadd.f32 %v368_v9, %v351_v17  ;;  %v1580_v21 = vadd.f32 %v372_v11, %v355_v18  ;;  %v1582_v23 = vadd.f32 %v376_v16, %v359_v19  ;;  %v1622_v18 = vstv %s1607_s10 }
  0xf0   : > { %v1624_v19 = vstv %s1170_s12 }
  0xf1   : > { %v378_v25 = vmul.f32 %v1578_v20, %v1578_v20  ;;  %v379_v27 = vmul.f32 %v1580_v21, %v1580_v21  ;;  %v381_v31 = vmul.f32 %v1582_v23, %v1582_v23 }
  0xf3   : > { %v380_v29 = vadd.f32 %v379_v27, %v378_v25  ;;  %v1626_v25 = vstv %s1176_s13 }
  0xf5   : > { %v382_v32 = vadd.f32 %v381_v31, %v380_v29 }
  0xf7   : > { %1275 = vrsqrt.f32 %v382_v32  ;;  %vm385_vm1 = vcmp.eq.f32.partialorder %v382_v32, inf  ;;  %v388_v35 = vand.u32 2147483648, %v382_v32  ;;  %vm387_vm2 = vcmp.eq.f32.partialorder %v382_v32, 0.0 }
 0x101   : > { %v1276_v33 = vpop.eup %1275 }
 0x102   : > { %v384_v34 = vmul.f32 %v1276_v33, %v382_v32 }
 0x104   : > { %v386_v36 = vsel %vm385_vm1, %v382_v32, %v384_v34 }
 0x105   : > { %v1590_v38 = vsel %vm387_vm2, %v388_v35, %v386_v36 }
 0x106   : > { %v393_v39 = vand.u32 2139095040, %v1590_v38  ;;  %v390_v42 = vand.u32 2147483647, %v1590_v38  ;;  %vm392_vm11 = vcmp.lt.s32.totalorder %v1590_v38, 0  ;;  %vm598_vm12 = vcmp.lt.f32.partialorder %v1590_v38, 1e-08 }
 0x107   : > { %vm482_vm13 = vweird.f32 %v1590_v38 }
 0x108   : > { %v394_v40 = vshrl.u32 %v393_v39, 23  ;;  %v397_v43 = vand.u32 8388607, %v390_v42  ;;  %vm391_vm10 = vcmp.le.f32.partialorder %v390_v42, 0.7853982 }
 0x10a   : > { %v1154_v41 = vadd.s32 4294967169, %v394_v40  ;;  %v398_v46 = vor.u32 8388608, %v397_v43 }
 0x10c   : > { %v400_v13 = vadd.s32 1, %v1154_v41  ;;  %v438_v61 = vshll.u32 %v398_v46, 8  ;;  %v1642_v46 = vstv %s1172_s14 }
 0x10e   : > { %vm401_vm3 = vcmp.gt.s32.totalorder %v400_v13, 0 }
 0x10f   : > { %v402_v44 = vsel %vm401_vm3, %v400_v13, 0 }
 0x110   : > { %v404_v45 = vand.u32 31, %v402_v44  ;;  %v403_v10 = vshrl.u32 %v402_v44, 5  ;;  %v1616_v15 = vpop.permute.xlu1 %821 }
 0x111   : > { %v1619_v17 = vmul.f32 %v1616_v15, %v819_v58 }
 0x112   : > { %v405_v47 = vsub.s32 32, %v404_v45  ;;  %v407_v50 = vshll.u32 %v1382_v22, %v404_v45  ;;  %v410_v51 = vshll.u32 %v1383_v24, %v404_v45  ;;  %v413_v52 = vshll.u32 %v1384_v26, %v404_v45 }
 0x113   : > { %v416_v53 = vshll.u32 %v1385_v28, %v404_v45  ;;  %v419_v59 = vshll.u32 %v1386_v30, %v404_v45  ;;  %vm422_vm4 = vcmp.lt.s32.totalorder %v403_v10, 1  ;;  %vm425_vm5 = vcmp.lt.s32.totalorder %v403_v10, 4 }
 0x114   : > { %v408_v54 = vshrl.u32 %v1383_v24, %v405_v47  ;;  %v411_v55 = vshrl.u32 %v1384_v26, %v405_v47  ;;  %v414_v56 = vshrl.u32 %v1385_v28, %v405_v47  ;;  %v417_v57 = vshrl.u32 %v1386_v30, %v405_v47  ;;  %v1637_v36 = vpop.permute.xlu1 %878 }
 0x115   : > { %v420_v60 = vshrl.u32 %v1387_v37, %v405_v47  ;;  %v406_v24 = vshrl.u32 %v1382_v22, %v405_v47  ;;  %vm424_vm6 = vcmp.lt.s32.totalorder %v403_v10, 3  ;;  %vm423_vm7 = vcmp.lt.s32.totalorder %v403_v10, 2 }
 0x116   : > { %v409_v62 = vor.u32 %v408_v54, %v407_v50  ;;  %v412_v63 = vor.u32 %v411_v55, %v410_v51  ;;  %v415_v0 = vor.u32 %v414_v56, %v413_v52  ;;  %v418_v1 = vor.u32 %v417_v57, %v416_v53 }
 0x117   : > { %v421_v26 = vor.u32 %v420_v60, %v419_v59  ;;  %v839_v32 = vmul.f32 %v1624_v19, %v1619_v17  ;;  %v852_v33 = vmul.f32 %v1622_v18, %v1619_v17  ;;  %v865_v34 = vmul.f32 %v1626_v25, %v1619_v17 }
 0x118   : > { %v427_v28 = vsel %vm425_vm5, %v415_v0, 2102212464  ;;  %v430_v2 = vsel %vm422_vm4, %v409_v62, %v412_v63  ;;  %v431_v30 = vsel %vm425_vm5, %v418_v1, 920167782  ;;  %v434_v3 = vsel %vm422_vm4, %v412_v63, %v415_v0  ;;  %v816_v13 = vpop.permute.xlu1 %815 }
 0x119   : > { %v432_v37 = vsel %vm424_vm6, %v415_v0, %v431_v30  ;;  %v435_v4 = vsel %vm425_vm5, %v421_v26, 1326507024  ;;  %v426_v5 = vsel %vm422_vm4, %v406_v24, %v409_v62  ;;  %v428_v6 = vsel %vm424_vm6, %v412_v63, %v427_v28 }
 0x11a   : > { %v433_v7 = vsel %vm423_vm7, %v430_v2, %v432_v37  ;;  %v436_v8 = vsel %vm424_vm6, %v418_v1, %v435_v4  ;;  %v429_v16 = vsel %vm423_vm7, %v426_v5, %v428_v6  ;;  %v1640_v44 = vmul.f32 %v816_v13, %v1570_v49  ;;  %v875_v6 = vpop.permute.xlu0 %874 }
 0x11b   : > { %v437_v9 = vsel %vm423_vm7, %v434_v3, %v436_v8  ;;  %v1610_v11 = vmul.u32.u64.low %v438_v61, %v433_v7  ;;  %v1611_v12 = vmul.u32.u64.high %v438_v61, %v433_v7, %v1610_v11  ;;  %v445_v29 = vmul.u32 %v438_v61, %v429_v16 }
 0x11c   : > { %v1613_v22 = vmul.u32.u64.low %v438_v61, %v437_v9  ;;  %v1614_v14 = vmul.u32.u64.high %v438_v61, %v437_v9, %v1613_v22  ;;  %v1644_v47 = vstv %s834_s19  ;;  %v1646_v10 = vstv %s1175_s15 }
 0x11d   : > { %v448_v27 = vadd.s32 1, %v1611_v12  ;;  %v836_v52 = vmul.f32 %v1644_v47, %v1640_v44  ;;  %v849_v53 = vmul.f32 %v1642_v46, %v1640_v44  ;;  %v862_v54 = vmul.f32 %v1646_v10, %v1640_v44 }
 0x11e   : > { %vm447_vm8 = vc.u32 %v1614_v14, %v1610_v11  ;;  %v446_v60 = vadd.s32 %v1610_v11, %v1614_v14  ;;  %v883_v28 = vsub.f32 0.0, %v1568_v48  ;;  %v599_v30 = vmax.f32 %v1590_v38, 1e-20 }
 0x11f   : > { %v449_v31 = vsel %vm447_vm8, %v448_v27, %v1611_v12  ;;  %v1654_v56 = vadd.f32 %v839_v32, %v836_v52  ;;  %v1656_v57 = vadd.f32 %v852_v33, %v849_v53  ;;  %v1658_v58 = vadd.f32 %v865_v34, %v862_v54 }
 0x120   : > { %v450_v35 = vadd.s32 %v449_v31, %v445_v29  ;;  %v873_v4 = vmul.f32 %v1616_v15, %v1568_v48  ;;  %v884_v5 = vmul.f32 %v883_v28, %v1616_v15  ;;  %1277 = vrcp.f32 %v599_v30 }
 0x121   : > { %v886_v12 = vmul.f32 %v875_v6, %v1570_v49  ;;  %v881_v22 = vmul.f32 %v1637_v36, %v1570_v49  ;;  %v932_v29 = vmul.f32 %v1616_v15, %v1570_v49  ;;  %v930_v42 = vmul.f32 %v1637_v36, %v1568_v48 }
 0x122   : > { %v451_v39 = vadd.s32 536870912, %v450_v35  ;;  %v877_v11 = vmul.f32 %v875_v6, %v873_v4  ;;  %v885_v14 = vmul.f32 %v884_v5, %v1637_v36  ;;  %v929_v32 = vmul.f32 %v875_v6, %v1619_v17 }
 0x123   : > { %v842_v49 = vstv %s1171_s16  ;;  %v888_v15 = vmul.f32 %v883_v28, %v816_v13  ;;  %v1687_v53 = vstv %s1174_s17  ;;  %v1689_v54 = vstv %s1177_s23 }
 0x124   : > { %v452_v40 = vshrl.u32 %v451_v39, 30  ;;  %v882_v34 = vadd.f32 %v881_v22, %v877_v11  ;;  %v933_v39 = vmul.f32 %v932_v29, %v1637_v36  ;;  %vm1011_vm7 = vcmask 1024  }
 0x126   : > { %v453_v41 = vshll.u32 %v452_v40, 30  ;;  %v476_v8 = vsub.s32 4, %v452_v40  ;;  %v896_v17 = vmul.f32 %v882_v34, %v1644_v47 }
 0x128   : > { %v454_v43 = vsub.s32 %v450_v35, %v453_v41  ;;  %v477_v27 = vsel %vm392_vm11, %v476_v8, %v452_v40  ;;  %v887_v35 = vadd.f32 %v886_v12, %v885_v14  ;;  %v934_v40 = vmul.f32 %v875_v6, %v1568_v48 }
 0x129   : > { %v479_v33 = vsel %vm391_vm10, 0, %v477_v27  ;;  %v869_v27 = vmul.f32 %v1689_v54, %v1568_v48 }
 0x12a   : > { %v456_v45 = vsub.s32 0, %v454_v43  ;;  %v586_v41 = vadd.s32 3, %v479_v33  ;;  %v897_v52 = vmul.f32 %v887_v35, %v1624_v19  ;;  %v935_v36 = vadd.f32 %v934_v40, %v933_v39 }
 0x12c   : > { %v1155_v50 = vmin.u32 %v456_v45, %v454_v43  ;;  %v1278_v45 = vpop.eup %1277  ;;  %v587_v13 = vand.u32 3, %v586_v41  ;;  %v942_v30 = vmul.f32 %v935_v36, %v1624_v19 }
 0x12e   : > { %v458_v51 = vclz %v1155_v50  ;;  %v907_v50 = vmul.f32 %v882_v34, %v1642_v46  ;;  %vm592_vm15 = vcmp.eq.s32.totalorder %v587_v13, 2  ;;  %vm589_vm1 = vcmp.eq.s32.totalorder %v587_v13, 0 }
 0x12f   : > { %vm588_vm3 = vcmp.lt.s32.totalorder %v587_v13, 2 }
 0x130   : > { %v1156_v55 = vadd.s32 4294967294, %v458_v51  ;;  %v908_v51 = vmul.f32 %v887_v35, %v1622_v18 }
 0x132   : > { %vm1157_vm9 = vcmp.lt.s32.totalorder %v1156_v55, 0 }
 0x133   : > { %v461_v59 = vsel %vm1157_vm9, 0, %v1156_v55  ;;  %v483_v55 = vand.u32 3, %v479_v33 }
 0x134   : > { %v462_v61 = vsub.s32 32, %v461_v59  ;;  %v466_v62 = vsub.s32 4294967266, %v461_v59  ;;  %v463_v63 = vshll.u32 %v454_v43, %v461_v59  ;;  %v1681_v43 = vadd.f32 %v930_v42, %v929_v32 }
 0x135   : > { %v1693_v59 = vmul.f32 %v842_v49, %v1568_v48  ;;  %vm488_vm14 = vcmp.eq.s32.totalorder %v483_v55, 2  ;;  %vm485_vm0 = vcmp.eq.s32.totalorder %v483_v55, 0  ;;  %vm484_vm2 = vcmp.lt.s32.totalorder %v483_v55, 2 }
 0x136   : > { %v464_v0 = vshrl.u32 %v446_v60, %v462_v61  ;;  %v467_v1 = vadd.s32 127, %v466_v62  ;;  %v602_v60 = vsel %vm598_vm12, 0.0, %v1278_v45  ;;  %v899_v61 = vmul.f32 %v888_v15, %v842_v49 }
 0x137   : > { %v941_v62 = vmul.f32 %v1681_v43, %v1644_v47  ;;  %v944_v47 = vmul.f32 %v842_v49, %v1640_v44  ;;  %v603_v22 = vmul.f32 %v602_v60, %v1578_v20  ;;  %v604_v29 = vmul.f32 %v602_v60, %v1580_v21 }
 0x138   : > { %v465_v24 = vor.u32 %v464_v0, %v463_v63  ;;  %v468_v26 = vshll.u32 %v467_v1, 23  ;;  %v910_v0 = vmul.f32 %v888_v15, %v1687_v53  ;;  %v921_v1 = vmul.f32 %v888_v15, %v1689_v54 }
 0x139   : > { %v943_v19 = vadd.f32 %v942_v30, %v941_v62  ;;  %v963_v20 = vmul.f32 %v1681_v43, %v1646_v10 }
 0x13a   : > { %v469_v2 = vor.u32 4788187, %v468_v26  ;;  %v472_v3 = vcvt.s32.f32 %v465_v24  ;;  %v909_v24 = vadd.f32 %v908_v51, %v907_v50  ;;  %v898_v26 = vadd.f32 %v897_v52, %v896_v17 }
 0x13b   : > { %v945_v41 = vadd.f32 %v944_v47, %v943_v19  ;;  %v952_v52 = vmul.f32 %v1681_v43, %v1642_v46  ;;  %v966_v46 = vmul.f32 %v1689_v54, %v1640_v44 }
 0x13c   : > { %v470_v37 = vand.u32 2147483647, %v469_v2  ;;  %v911_v33 = vadd.f32 %v910_v0, %v909_v24  ;;  %v870_v0 = vadd.f32 %v869_v27, %v1658_v58  ;;  %v955_v58 = vmul.f32 %v1687_v53, %v1640_v44 }
 0x13e   : > { %v473_v7 = vmul.f32 %v472_v3, %v470_v37  ;;  %v918_v37 = vmul.f32 %v882_v34, %v1646_v10  ;;  %v919_v3 = vmul.f32 %v887_v35, %v1626_v25  ;;  %v900_v34 = vadd.f32 %v899_v61, %v898_v26 }
 0x13f   : > { %v964_v35 = vmul.f32 %v935_v36, %v1626_v25  ;;  %v953_v10 = vmul.f32 %v935_v36, %v1622_v18 }
 0x140   : > { %v474_v9 = vxor.u32 2147483648, %v473_v7  ;;  %v920_v12 = vadd.f32 %v919_v3, %v918_v37 }
 0x141   : > { %v965_v17 = vadd.f32 %v964_v35, %v963_v20  ;;  %v954_v30 = vadd.f32 %v953_v10, %v952_v52 }
 0x142   : > { %v475_v16 = vsel %vm392_vm11, %v474_v9, %v473_v7  ;;  %v922_v49 = vadd.f32 %v921_v1, %v920_v12 }
 0x143   : > { %v478_v31 = vsel %vm391_vm10, %v1590_v38, %v475_v16  ;;  %v856_v16 = vmul.f32 %v1687_v53, %v1568_v48  ;;  %v967_v54 = vadd.f32 %v966_v46, %v965_v17 }
 0x144   : > { %1279 = vcosq.f32 %v478_v31 }
 0x145   : > { %1281 = vsinq.f32 %v478_v31  ;;  %v605_v31 = vmul.f32 %v602_v60, %v1582_v23  ;;  %v857_v18 = vadd.f32 %v856_v16, %v1656_v57 }
 0x14e   : > { %v1280_v63 = vpop.eup %1279 }
 0x14f   : > { %v1282_v28 = vpop.eup %1281  ;;  %v489_v2 = vxor.u32 2147483648, %v1280_v63 }
 0x150   : > { %v486_v4 = vxor.u32 2147483648, %v1282_v28 }
 0x151   : > { %v490_v5 = vsel %vm488_vm14, %v489_v2, %v1282_v28  ;;  %v594_v6 = vsel %vm592_vm15, %v489_v2, %v1282_v28  ;;  %v844_v2 = vadd.f32 %v1693_v59, %v1654_v56  ;;  %v956_v59 = vadd.f32 %v955_v58, %v954_v30 }
 0x152   : > { %v487_v7 = vsel %vm485_vm0, %v1280_v63, %v486_v4  ;;  %v591_v8 = vsel %vm589_vm1, %v1280_v63, %v486_v4 }
 0x153   : > { %v491_v9 = vsel %vm484_vm2, %v487_v7, %v490_v5  ;;  %v595_v11 = vsel %vm588_vm3, %v591_v8, %v594_v6 }
 0x154   : > { %v492_v14 = vsel %vm482_vm13, nan, %v491_v9  ;;  %v596_v32 = vsel %vm482_vm13, nan, %v595_v11 }
 0x155   : > { %v597_v42 = vsub.f32 1.0, %v492_v14  ;;  %v829_v48 = vmul.f32 %v605_v31, %v596_v32  ;;  %v832_v15 = vmul.f32 %v604_v29, %v596_v32  ;;  %v894_v21 = vmul.f32 %v603_v22, %v596_v32 }
 0x157   : > { %v890_v39 = vmul.f32 %v604_v29, %v597_v42  ;;  %v825_v40 = vmul.f32 %v603_v22, %v597_v42  ;;  %v938_v45 = vmul.f32 %v605_v31, %v597_v42 }
 0x159   : > { %v891_v23 = vmul.f32 %v890_v39, %v604_v29  ;;  %v828_v50 = vmul.f32 %v825_v40, %v604_v29  ;;  %v831_v51 = vmul.f32 %v825_v40, %v605_v31  ;;  %v893_v38 = vmul.f32 %v890_v39, %v605_v31 }
 0x15a   : > { %v826_v55 = vmul.f32 %v825_v40, %v603_v22  ;;  %v939_v28 = vmul.f32 %v938_v45, %v605_v31 }
 0x15b   : > { %v892_v25 = vadd.f32 %v891_v23, %v492_v14  ;;  %v889_v13 = vadd.f32 %v829_v48, %v828_v50  ;;  %v936_v60 = vsub.f32 %v831_v51, %v832_v15  ;;  %v895_v61 = vsub.f32 %v893_v38, %v894_v21 }
 0x15c   : > { %v937_v62 = vadd.f32 %v894_v21, %v893_v38  ;;  %v833_v63 = vadd.f32 %v832_v15, %v831_v51  ;;  %v827_v1 = vadd.f32 %v826_v55, %v492_v14  ;;  %v830_v36 = vsub.f32 %v828_v50, %v829_v48 }
 0x15d   : > { %v912_v24 = vmul.f32 %v911_v33, %v892_v25  ;;  %v901_v26 = vmul.f32 %v900_v34, %v889_v13  ;;  %v946_v4 = vmul.f32 %v945_v41, %v936_v60  ;;  %v923_v47 = vmul.f32 %v922_v49, %v895_v61 }
 0x15e   : > { %v871_v43 = vmul.f32 %v870_v0, %v833_v63  ;;  %v845_v37 = vmul.f32 %v844_v2, %v827_v1  ;;  %v858_v3 = vmul.f32 %v857_v18, %v830_v36  ;;  %v940_v5 = vadd.f32 %v939_v28, %v492_v14 }
 0x15f   : > { %914 = vrot.lane.b32.xlu0 %v912_v24, %s1390_s24  ;;  %903 = vrot.lane.b32.xlu1 %v901_v26, %s1390_s24  ;;  %v957_v7 = vmul.f32 %v956_v59, %v937_v62 }
 0x160   : > { %v859_v56 = vadd.f32 %v858_v3, %v845_v37  ;;  %v968_v6 = vmul.f32 %v967_v54, %v940_v5 }
 0x162   : > { %v872_v57 = vadd.f32 %v871_v43, %v859_v56 }
 0x163   : > { %948 = vrot.lane.b32.xlu0 %v946_v4, %s1390_s24  ;;  %925 = vrot.lane.b32.xlu1 %v923_v47, %s1390_s24 }
 0x167   : > { %970 = vrot.lane.b32.xlu0 %v968_v6, %s1390_s24  ;;  %959 = vrot.lane.b32.xlu1 %v957_v7, %s1390_s24 }
 0x1d1   : > { %v915_v8 = vpop.permute.xlu0 %914  ;;  %v904_v9 = vpop.permute.xlu1 %903 }
 0x1d2   : > { %v906_v11 = vadd.f32 %v904_v9, %v872_v57 }
 0x1d4   : > { %v917_v19 = vadd.f32 %v915_v8, %v906_v11 }
 0x1d5   : > { %v949_v44 = vpop.permute.xlu0 %948  ;;  %v926_v53 = vpop.permute.xlu1 %925 }
 0x1d6   : > { %v928_v12 = vadd.f32 %v926_v53, %v917_v19 }
 0x1d8   : > { %v951_v22 = vadd.f32 %v949_v44, %v928_v12 }
 0x1d9   : > { %v960_v16 = vpop.permute.xlu1 %959  ;;  %v971_v27 = vpop.permute.xlu0 %970 }
 0x1da   : > { %v962_v14 = vadd.f32 %v960_v16, %v951_v22 }
 0x1dc   : > { %v973_v29 = vadd.f32 %v971_v27, %v962_v14 }
 0x1de   : > { %v1178_v31 = vadd.f32 -1.0, %v973_v29 }
 0x1e0   : > { %v975_v42 = vmul.f32 0.5, %v1178_v31 }
 0x1e2   : > { %v1179_v32 = vclamps-f32 %v975_v42, 0.999 }
 0x1e4   : > { %v978_v33 = vand.u32 2147483647, %v1179_v32  ;;  %vm1003_vm6 = vcmp.ge.f32.partialorder %v1179_v32, 0.0 }
 0x1e6   : > { %v979_v34 = vmul.f32 -0.0012624911, %v978_v33  ;;  %v993_v20 = vsub.f32 1.0, %v978_v33 }
 0x1e8   : > { %v980_v35 = vadd.f32 0.00667009, %v979_v34  ;;  %v994_v39 = vmax.f32 %v993_v20, 0.0 }
 0x1ea   : > { %v981_v40 = vmul.f32 %v980_v35, %v978_v33  ;;  %1283 = vrsqrt.f32 %v994_v39  ;;  %vm997_vm4 = vcmp.eq.f32.partialorder %v994_v39, inf  ;;  %v1000_v55 = vand.u32 2147483648, %v994_v39 }
 0x1eb   : > { %vm999_vm5 = vcmp.eq.f32.partialorder %v994_v39, 0.0 }
 0x1ec   : > { %v982_v41 = vadd.f32 -0.017088126, %v981_v40 }
 0x1ee   : > { %v983_v49 = vmul.f32 %v982_v41, %v978_v33 }
 0x1f0   : > { %v984_v48 = vadd.f32 0.03089188, %v983_v49 }
 0x1f2   : > { %v985_v15 = vmul.f32 %v984_v48, %v978_v33 }
 0x1f4   : > { %v986_v21 = vadd.f32 -0.050174303, %v985_v15  ;;  %v1284_v23 = vpop.eup %1283 }
 0x1f5   : > { %v996_v38 = vmul.f32 %v1284_v23, %v994_v39 }
 0x1f6   : > { %v987_v45 = vmul.f32 %v986_v21, %v978_v33 }
 0x1f7   : > { %v998_v10 = vsel %vm997_vm4, %v994_v39, %v996_v38 }
 0x1f8   : > { %v988_v50 = vadd.f32 0.08897899, %v987_v45  ;;  %v1001_v13 = vsel %vm999_vm5, %v1000_v55, %v998_v10 }
 0x1fa   : > { %v989_v51 = vmul.f32 %v988_v50, %v978_v33 }
 0x1fc   : > { %v990_v17 = vadd.f32 -0.2145988, %v989_v51 }
 0x1fe   : > { %v991_v52 = vmul.f32 %v990_v17, %v978_v33 }
 0x200   : > { %v992_v25 = vadd.f32 1.5707963, %v991_v52 }
 0x202   : > { %v1002_v60 = vmul.f32 %v1001_v13, %v992_v25 }
 0x204   : > { %v1004_v61 = vsub.f32 3.1415927, %v1002_v60 }
 0x206   : > { %v1005_v62 = vsel %vm1003_vm6, %v1002_v60, %v1004_v61 }
 0x207   : > { %v1006_v63 = vmul.f32 %v1005_v62, %v1005_v62 }
 0x209   : > { %1008 = vrot.lane.b32.xlu1 %v1006_v63, %s1388_s18 }
 0x27b   : > { %v1009_v0 = vpop.permute.xlu1 %1008 }
 0x27c   : > { %1012 = vst.msk [vmem:[%s301_s11] sm:$0x3] %vm1011_vm7, %v1009_v0 }
 0x27d PF: > { %s17_s22 = sadd.s32 1, %s1376_s22   ;;  %s1765_s18 = smov %s1368_s20 }
 0x27e   : > { %p14_p11 = scmp.ge.s32.totalorder %s17_s22, 6   ;;  %s1766_s19 = smov %s1372_s21 }
 0x27f   : > { %s1767_s20 = smov %s1770_s30  ;;  %s1768_s21 = smov %s1774_s9 }
 0x280   :  { %16 = sbr.rel (!%p14_p11) target bundleno = 4 (0x4), region = 96 }
 0x287   :  { %1032 = vsyncpa [#allocation4], 1 }
 0x288   :  { %1034 = vsyncpa [#allocation4 + $0x1], 1 }
 0x289   :  { %1035 = vsyncpa [#allocation6], 1 }

</bundles_post_ra>
